<compile_context>
chip_gen: v6e
topology: v6e:2x2x1
jax: 0.10.0
libtpu: 0.0.40
codegen_flags: <defaults>
</compile_context>

<pallas_src>
import functools

import numpy as np

import jax
import jax.numpy as jnp
from jax.experimental import pallas as pl
from jax.experimental.pallas import tpu as pltpu


def _cdiv(a, b):
    return -(-a // b)


def _round_up(x, m):
    return _cdiv(x, m) * m


# VMEM budgeting: our own buffers are budgeted against _VMEM_TILE_BUDGET and
# the compiler scoped limit is raised to _VMEM_LIMIT_BYTES (safe on v5e/v6e's
# 128 MiB and below v7x's 64 MiB physical VMEM).
_VMEM_TILE_BUDGET = 40 * 1024 * 1024
_VMEM_LIMIT_BYTES = 52 * 1024 * 1024
_MAX_BATCH_TILE = 4096
_MIN_SPLIT_ROWS = 512   # force >=2 grid steps once the batch exceeds 2*this (v7x megacore)


def _choose_batch_tile(B, I, O, H2, num_layers, n_extra, L_out, wbytes,
                       split_h, n_wbuf):
    """Pick the batch tile so weights + pipelined tiles + live activations fit
    the VMEM budget, while keeping >=2 grid steps for large batches (v7x)."""
    row_align = 16 if wbytes < 4 else 8
    H = H2 // 2
    wh_elems = n_extra * (2 * H * H if split_h else H2 * H2)
    weight_bytes = n_wbuf * wbytes * (I * num_layers * H2 + wh_elems + H2 * L_out)
    weight_bytes += 4 * (num_layers * H2 + L_out)              # f32 biases
    per_row = (2 * I * wbytes                                  # xu tile, double-buffered
               + 2 * 4 * (O + 1)                               # output tiles, double-buffered
               + 4 * (num_layers * H2 + 3 * H2 + L_out))       # xw, h/hc, head (f32)
    tb = (_VMEM_TILE_BUDGET - weight_bytes) // per_row
    tb = max(row_align, min(_MAX_BATCH_TILE, tb))
    tb = (tb // row_align) * row_align
    B_al = _round_up(B, row_align)
    min_steps = 2 if B_al >= 2 * _MIN_SPLIT_ROWS else 1
    n_steps = max(_cdiv(B_al, tb), min_steps)
    TB = _round_up(_cdiv(B_al, n_steps), row_align)
    B_pad = n_steps * TB
    return TB, B_pad, n_steps


def d2rl_kernel(xu_ref, wx_ref, wh_ref, b_ref, wo_ref, bo_ref,
                logits_ref, value_ref, *, H, n_extra, num_out, split_h):
    H2 = 2 * H
    cdt = wx_ref.dtype

    xu = xu_ref[...]                                  # (TB, I), compute dtype
    b_all = b_ref[...]                                # (num_layers, 2H), f32

    # One wide-N MXU pass covering the first layer and every D2RL skip
    # connection: xw[:, l*2H:(l+1)*2H] = xu @ [Wx1_l | Wx2_l].
    xw = jnp.dot(xu, wx_ref[...], preferred_element_type=jnp.float32)

    # Layer 1 (both branches fused across the 2H lanes).
    h = jnp.maximum(xw[:, :H2] + b_all[0:1, :], 0.0)

    # Layers 2..num_layers:  relu(h @ Wh + xu @ Wx + b)  (the D2RL concat).
    for l in range(n_extra):
        base = (l + 1) * H2
        hc = h.astype(cdt)
        if split_h:
            # H multiple of 128: two dense (TB,H)@(H,H) matmuls (halves MXU
            # work vs. the zero-padded block-diagonal form).
            z = jnp.concatenate(
                [jnp.dot(hc[:, :H], wh_ref[2 * l],
                         preferred_element_type=jnp.float32),
                 jnp.dot(hc[:, H:], wh_ref[2 * l + 1],
                         preferred_element_type=jnp.float32)],
                axis=1)
        else:
            # H == 64: the fused block-diagonal (.,128)@(128,128) matmul is
            # already the MXU minimum shape.
            z = jnp.dot(hc, wh_ref[l], preferred_element_type=jnp.float32)
        h = jnp.maximum(z + xw[:, base:base + H2] + b_all[l + 1:l + 2, :], 0.0)

    # Fused output head: lanes [0:O) = action logits, lane O = value.
    head = jnp.dot(h.astype(cdt), wo_ref[...],
                   preferred_element_type=jnp.float32) + bo_ref[...]
    logits_ref[...] = head[:, :num_out]
    value_ref[...] = head[:, num_out:num_out + 1]


@functools.partial(
    jax.jit,
    static_argnames=("num_outputs", "hidden_dim", "num_layers",
                     "compute_dtype", "single_buffer_weights"))
def d2rl_forward(xu, weights, *, num_outputs, hidden_dim, num_layers,
                 compute_dtype=jnp.bfloat16, single_buffer_weights=True):
    """Returns (value, action_logits) for a batch of network inputs."""
    B, I = xu.shape
    O, H = num_outputs, hidden_dim
    H2 = 2 * H
    n_extra = num_layers - 1
    assert num_layers in (2, 4, 6, 8)
    assert H % 64 == 0, "hidden_dim must be a multiple of 64"
    split_h = (H % 128 == 0)              # dense per-branch Wh matmuls for H >= 128
    L_out = _round_up(O + 1, 128)         # head lane width, decoupled from 2H
    cdt = jnp.dtype(compute_dtype)
    n_wbuf = 1 if single_buffer_weights else 2

    TB, B_pad, n_steps = _choose_batch_tile(
        B, I, O, H2, num_layers, n_extra, L_out, cdt.itemsize, split_h, n_wbuf)

    # Cast activations & weights to the compute dtype at the call boundary
    # (accumulation stays f32 inside the kernel); biases stay f32.
    xu_c = xu.astype(cdt)
    if B_pad != B:
        xu_c = jnp.pad(xu_c, ((0, B_pad - B), (0, 0)))
    wx = weights["wx"].astype(cdt)
    wh = weights["wh"].astype(cdt)
    w_head = weights["w_head"].astype(cdt)
    b_all = weights["b_layers"].astype(jnp.float32)
    b_head = weights["b_head"].astype(jnp.float32)

    def const_spec(shape):
        # Weights are pinned to block (0, ...): single-buffer them so their
        # VMEM footprint is 1x, not 2x.
        nd = len(shape)
        idx = lambda i: (0,) * nd
        if single_buffer_weights and hasattr(pl, "Buffered"):
            try:
                return pl.BlockSpec(shape, idx, pipeline_mode=pl.Buffered(1))
            except TypeError:
                pass
        return pl.BlockSpec(shape, idx)

    kernel = functools.partial(
        d2rl_kernel, H=H, n_extra=n_extra, num_out=O, split_h=split_h)

    wh_mults = n_extra * (2 * H * H if split_h else H2 * H2)
    flops = 2 * B_pad * (I * num_layers * H2 + wh_mults + H2 * L_out)
    bytes_accessed = (cdt.itemsize * (B_pad * I + I * num_layers * H2
                                      + wh_mults + H2 * L_out)
                      + 4 * (num_layers * H2 + L_out)
                      + 4 * B_pad * (O + 1))

    logits, value = pl.pallas_call(
        kernel,
        out_shape=(jax.ShapeDtypeStruct((B_pad, O), jnp.float32),
                   jax.ShapeDtypeStruct((B_pad, 1), jnp.float32)),
        grid=(n_steps,),
        in_specs=[
            pl.BlockSpec((TB, I), lambda i: (i, 0)),   # batch-tiled activations
            const_spec(wx.shape),                      # [W_in | Wx_1 | ...] fused
            const_spec(wh.shape),                      # per-layer h-facing weights
            const_spec(b_all.shape),                   # per-layer biases (f32)
            const_spec(w_head.shape),                  # fused output head
            const_spec(b_head.shape),                  # head bias (f32)
        ],
        out_specs=(pl.BlockSpec((TB, O), lambda i: (i, 0)),
                   pl.BlockSpec((TB, 1), lambda i: (i, 0))),
        compiler_params=pltpu.CompilerParams(
            dimension_semantics=("parallel",),
            vmem_limit_bytes=_VMEM_LIMIT_BYTES),
        cost_estimate=pl.CostEstimate(
            flops=flops, transcendentals=0, bytes_accessed=bytes_accessed),
    )(xu_c, wx, wh, b_all, w_head, b_head)

    if B_pad != B:
        logits = logits[:B]
        value = value[:B]
    # PyTorch returns (value, self.dist(action_logits)).
    # TODO(synk): `dist` is an arbitrary distribution constructor passed to
    # __init__; we return the raw action_logits in its place.
    return value, logits


# ----------------------------- parameters ------------------------------------


def _xavier(key, shape):
    fan_in, fan_out = shape
    limit = (6.0 / (fan_in + fan_out)) ** 0.5
    return jax.random.uniform(key, shape, jnp.float32, -limit, limit)


def init_params(key, num_inputs, num_outputs, hidden_dim, num_layers):
    """Per-branch (torch-equivalent) parameters, weights stored as (in, out)."""
    assert num_layers in (2, 4, 6, 8)
    I, H = num_inputs, hidden_dim
    in_dim = I + H
    n_extra = num_layers - 1

    keys = iter(jax.random.split(key, 4 * (2 + n_extra)))
    params = {}
    for b in ("1", "2"):
        out_dim = num_outputs if b == "1" else 1
        params[f"w{b}_in"] = _xavier(next(keys), (I, H))
        params[f"b{b}_in"] = jnp.zeros((1, H), jnp.float32)
        wh, wx = [], []
        for _ in range(n_extra):
            w_full = _xavier(next(keys), (in_dim, H))  # (in,out) = W.T of torch Linear
            wh.append(w_full[:H])   # rows multiplying h (cat order is [h, xu])
            wx.append(w_full[H:])   # rows multiplying xu
        params[f"w{b}_h"] = jnp.stack(wh)                        # (n_extra, H, H)
        params[f"w{b}_x"] = jnp.stack(wx)                        # (n_extra, I, H)
        params[f"b{b}_h"] = jnp.zeros((n_extra, H), jnp.float32)
        params[f"w{b}_out"] = _xavier(next(keys), (H, out_dim))
        params[f"b{b}_out"] = jnp.zeros((1, out_dim), jnp.float32)
    return params


def pack_params(params, num_inputs, num_outputs, hidden_dim, num_layers):
    """Fuse both branches and pack into the kernel's f32 weight buffers."""
    I, O, H = num_inputs, num_outputs, hidden_dim
    H2 = 2 * H
    n_extra = num_layers - 1
    split_h = (H % 128 == 0)
    L_out = _round_up(O + 1, 128)

    # xu-facing weights for every layer, lane-contiguous: [W_in | Wx_1 | ...].
    wx = np.zeros((I, num_layers * H2), np.float32)
    wx[:, 0:H] = np.asarray(params["w1_in"])
    wx[:, H:H2] = np.asarray(params["w2_in"])
    for l in range(n_extra):
        base = (l + 1) * H2
        wx[:, base:base + H] = np.asarray(params["w1_x"][l])
        wx[:, base + H:base + H2] = np.asarray(params["w2_x"][l])

    # h-facing weights: dense per-branch stack for H >= 128, block-diag for H=64.
    if split_h:
        wh = np.zeros((2 * n_extra, H, H), np.float32)
        for l in range(n_extra):
            wh[2 * l] = np.asarray(params["w1_h"][l])
            wh[2 * l + 1] = np.asarray(params["w2_h"][l])
    else:
        wh = np.zeros((n_extra, H2, H2), np.float32)
        for l in range(n_extra):
            wh[l, :H, :H] = np.asarray(params["w1_h"][l])
            wh[l, H:, H:] = np.asarray(params["w2_h"][l])

    b_layers = np.zeros((num_layers, H2), np.float32)
    b_layers[0, :H] = np.asarray(params["b1_in"])[0]
    b_layers[0, H:] = np.asarray(params["b2_in"])[0]
    for l in range(n_extra):
        b_layers[l + 1, :H] = np.asarray(params["b1_h"][l])
        b_layers[l + 1, H:] = np.asarray(params["b2_h"][l])

    # Output head: lanes [0:O) <- logits head, lane O <- value head.
    w_head = np.zeros((H2, L_out), np.float32)
    w_head[:H, :O] = np.asarray(params["w1_out"])
    w_head[H:, O] = np.asarray(params["w2_out"])[:, 0]
    b_head = np.zeros((1, L_out), np.float32)
    b_head[0, :O] = np.asarray(params["b1_out"])[0]
    b_head[0, O] = np.asarray(params["b2_out"])[0, 0]

    return {"wx": jnp.asarray(wx), "wh": jnp.asarray(wh),
            "b_layers": jnp.asarray(b_layers),
            "w_head": jnp.asarray(w_head), "b_head": jnp.asarray(b_head)}


def ref_forward(xu, params):
    """Pure-JAX reference using the explicit concat formulation (mirrors torch).

    NOTE: the original torch code feeds x1 to l2_8 for num_layers == 8 (an
    apparent typo); we use x2 (the value branch's own activations)."""
    def branch(prefix):
        h = jax.nn.relu(xu @ params[f"w{prefix}_in"] + params[f"b{prefix}_in"])
        wh, wx, bh = (params[f"w{prefix}_h"], params[f"w{prefix}_x"],
                      params[f"b{prefix}_h"])
        for l in range(wh.shape[0]):
            cat = jnp.concatenate([h, xu], axis=1)
            w_full = jnp.concatenate([wh[l], wx[l]], axis=0)
            h = jax.nn.relu(cat @ w_full + bh[l])
        return h @ params[f"w{prefix}_out"] + params[f"b{prefix}_out"]
    logits = branch("1")
    value = branch("2")
    return value, logits


if __name__ == "__main__":
    B, NUM_INPUTS, NUM_OUTPUTS, HIDDEN, NUM_LAYERS = 8, 16, 6, 64, 4

    key = jax.random.PRNGKey(0)
    k_x, k_p = jax.random.split(key)
    xu = jax.random.normal(k_x, (B, NUM_INPUTS), jnp.float32)
    params = init_params(k_p, NUM_INPUTS, NUM_OUTPUTS, HIDDEN, NUM_LAYERS)
    weights = pack_params(params, NUM_INPUTS, NUM_OUTPUTS, HIDDEN, NUM_LAYERS)
    cfg = dict(num_outputs=NUM_OUTPUTS, hidden_dim=HIDDEN, num_layers=NUM_LAYERS)

    # f32 path: tight check against the pure-JAX reference.
    sbw = True
    try:
        value, logits = jax.block_until_ready(
            d2rl_forward(xu, weights, compute_dtype=jnp.float32,
                         single_buffer_weights=True, **cfg))
    except Exception:
        # Fallback for jax versions without Buffered(1) support on pallas_call.
        sbw = False
        value, logits = jax.block_until_ready(
            d2rl_forward(xu, weights, compute_dtype=jnp.float32,
                         single_buffer_weights=False, **cfg))

    ref_value, ref_logits = ref_forward(xu, params)
    assert value.shape == (B, 1) and logits.shape == (B, NUM_OUTPUTS)
    assert jnp.allclose(value, ref_value, atol=1e-4, rtol=1e-4)
    assert jnp.allclose(logits, ref_logits, atol=1e-4, rtol=1e-4)

    # bf16 fast path (recommended on v6e/v7x): same kernel, looser tolerance.
    v_bf, l_bf = jax.block_until_ready(
        d2rl_forward(xu, weights, compute_dtype=jnp.bfloat16,
                     single_buffer_weights=sbw, **cfg))
    assert v_bf.shape == (B, 1) and l_bf.shape == (B, NUM_OUTPUTS)
    assert jnp.allclose(v_bf, ref_value, atol=3e-2, rtol=3e-2)
    assert jnp.allclose(l_bf, ref_logits, atol=3e-2, rtol=3e-2)

    print("KERNEL_OK")
</pallas_src>

<mosaic_0001>
module attributes {stable_mosaic.version = 11 : i64} {
  func.func @d2rl_kernel(%arg0: i32, %arg1: memref<8x16xf32, #tpu.memory_space<vmem>>, %arg2: memref<16x512xf32, #tpu.memory_space<vmem>>, %arg3: memref<3x128x128xf32, #tpu.memory_space<vmem>>, %arg4: memref<4x128xf32, #tpu.memory_space<vmem>>, %arg5: memref<128x128xf32, #tpu.memory_space<vmem>>, %arg6: memref<1x128xf32, #tpu.memory_space<vmem>>, %arg7: memref<8x6xf32, #tpu.memory_space<vmem>>, %arg8: memref<8x1xf32, #tpu.memory_space<vmem>>) attributes {dimension_semantics = [#tpu.dimension_semantics<parallel>], iteration_bounds = array<i64: 1>, scalar_prefetch = 0 : i64, scratch_operands = 0 : i64, tpu.core_type = #tpu.core_type<tc>, window_params = [{transform_indices = @transform_0, window_bounds = array<i64: 8, 16>}, {pipeline_mode = #tpu.pipeline_mode<synchronous>, transform_indices = @transform_1, window_bounds = array<i64: 16, 512>}, {pipeline_mode = #tpu.pipeline_mode<synchronous>, transform_indices = @transform_2, window_bounds = array<i64: 3, 128, 128>}, {pipeline_mode = #tpu.pipeline_mode<synchronous>, transform_indices = @transform_3, window_bounds = array<i64: 4, 128>}, {pipeline_mode = #tpu.pipeline_mode<synchronous>, transform_indices = @transform_4, window_bounds = array<i64: 128, 128>}, {pipeline_mode = #tpu.pipeline_mode<synchronous>, transform_indices = @transform_5, window_bounds = array<i64: 1, 128>}, {transform_indices = @transform_6, window_bounds = array<i64: 8, 6>}, {transform_indices = @transform_7, window_bounds = array<i64: 8, 1>}]} {
    %c0 = arith.constant 0 : index
    %c0_0 = arith.constant 0 : index
    %0 = vector.load %arg1[%c0, %c0_0] : memref<8x16xf32, #tpu.memory_space<vmem>>, vector<8x16xf32>
    %c0_1 = arith.constant 0 : index
    %c0_2 = arith.constant 0 : index
    %1 = vector.load %arg4[%c0_1, %c0_2] : memref<4x128xf32, #tpu.memory_space<vmem>>, vector<4x128xf32>
    %c0_3 = arith.constant 0 : index
    %c0_4 = arith.constant 0 : index
    %2 = vector.load %arg2[%c0_3, %c0_4] : memref<16x512xf32, #tpu.memory_space<vmem>>, vector<16x512xf32>
    %cst = arith.constant dense<0.000000e+00> : vector<8x512xf32>
    %3 = tpu.matmul %0, %2, %cst {dimension_numbers = #tpu.dot_dimension_numbers<[1], [0], [0], [1], [0, 0, 1, 1], [], []>} : vector<8x16xf32>, vector<16x512xf32>, vector<8x512xf32> -> vector<8x512xf32>
    %4 = vector.extract_strided_slice %3 {offsets = [0, 0], sizes = [8, 128], strides = [1, 1]} : vector<8x512xf32> to vector<8x128xf32>
    %5 = vector.extract_strided_slice %1 {offsets = [0, 0], sizes = [1, 128], strides = [1, 1]} : vector<4x128xf32> to vector<1x128xf32>
    %6 = vector.broadcast %5 : vector<1x128xf32> to vector<8x128xf32>
    %7 = arith.addf %4, %6 : vector<8x128xf32>
    %cst_5 = arith.constant 0.000000e+00 : f32
    %8 = vector.broadcast %cst_5 : f32 to vector<8x128xf32>
    %9 = arith.maximumf %7, %8 : vector<8x128xf32>
    %c0_6 = arith.constant 0 : index
    %c0_7 = arith.constant 0 : index
    %c0_8 = arith.constant 0 : index
    %10 = vector.load %arg3[%c0_6, %c0_7, %c0_8] : memref<3x128x128xf32, #tpu.memory_space<vmem>>, vector<1x128x128xf32>
    %11 = vector.shape_cast %10 : vector<1x128x128xf32> to vector<128x128xf32>
    %cst_9 = arith.constant dense<0.000000e+00> : vector<8x128xf32>
    %12 = tpu.matmul %9, %11, %cst_9 {dimension_numbers = #tpu.dot_dimension_numbers<[1], [0], [0], [1], [0, 0, 1, 1], [], []>} : vector<8x128xf32>, vector<128x128xf32>, vector<8x128xf32> -> vector<8x128xf32>
    %13 = vector.extract_strided_slice %3 {offsets = [0, 128], sizes = [8, 128], strides = [1, 1]} : vector<8x512xf32> to vector<8x128xf32>
    %14 = arith.addf %12, %13 : vector<8x128xf32>
    %15 = vector.extract_strided_slice %1 {offsets = [1, 0], sizes = [1, 128], strides = [1, 1]} : vector<4x128xf32> to vector<1x128xf32>
    %16 = vector.broadcast %15 : vector<1x128xf32> to vector<8x128xf32>
    %17 = arith.addf %14, %16 : vector<8x128xf32>
    %cst_10 = arith.constant 0.000000e+00 : f32
    %18 = vector.broadcast %cst_10 : f32 to vector<8x128xf32>
    %19 = arith.maximumf %17, %18 : vector<8x128xf32>
    %c1 = arith.constant 1 : index
    %c0_11 = arith.constant 0 : index
    %c0_12 = arith.constant 0 : index
    %20 = vector.load %arg3[%c1, %c0_11, %c0_12] : memref<3x128x128xf32, #tpu.memory_space<vmem>>, vector<1x128x128xf32>
    %21 = vector.shape_cast %20 : vector<1x128x128xf32> to vector<128x128xf32>
    %cst_13 = arith.constant dense<0.000000e+00> : vector<8x128xf32>
    %22 = tpu.matmul %19, %21, %cst_13 {dimension_numbers = #tpu.dot_dimension_numbers<[1], [0], [0], [1], [0, 0, 1, 1], [], []>} : vector<8x128xf32>, vector<128x128xf32>, vector<8x128xf32> -> vector<8x128xf32>
    %23 = vector.extract_strided_slice %3 {offsets = [0, 256], sizes = [8, 128], strides = [1, 1]} : vector<8x512xf32> to vector<8x128xf32>
    %24 = arith.addf %22, %23 : vector<8x128xf32>
    %25 = vector.extract_strided_slice %1 {offsets = [2, 0], sizes = [1, 128], strides = [1, 1]} : vector<4x128xf32> to vector<1x128xf32>
    %26 = vector.broadcast %25 : vector<1x128xf32> to vector<8x128xf32>
    %27 = arith.addf %24, %26 : vector<8x128xf32>
    %cst_14 = arith.constant 0.000000e+00 : f32
    %28 = vector.broadcast %cst_14 : f32 to vector<8x128xf32>
    %29 = arith.maximumf %27, %28 : vector<8x128xf32>
    %c2 = arith.constant 2 : index
    %c0_15 = arith.constant 0 : index
    %c0_16 = arith.constant 0 : index
    %30 = vector.load %arg3[%c2, %c0_15, %c0_16] : memref<3x128x128xf32, #tpu.memory_space<vmem>>, vector<1x128x128xf32>
    %31 = vector.shape_cast %30 : vector<1x128x128xf32> to vector<128x128xf32>
    %cst_17 = arith.constant dense<0.000000e+00> : vector<8x128xf32>
    %32 = tpu.matmul %29, %31, %cst_17 {dimension_numbers = #tpu.dot_dimension_numbers<[1], [0], [0], [1], [0, 0, 1, 1], [], []>} : vector<8x128xf32>, vector<128x128xf32>, vector<8x128xf32> -> vector<8x128xf32>
    %33 = vector.extract_strided_slice %3 {offsets = [0, 384], sizes = [8, 128], strides = [1, 1]} : vector<8x512xf32> to vector<8x128xf32>
    %34 = arith.addf %32, %33 : vector<8x128xf32>
    %35 = vector.extract_strided_slice %1 {offsets = [3, 0], sizes = [1, 128], strides = [1, 1]} : vector<4x128xf32> to vector<1x128xf32>
    %36 = vector.broadcast %35 : vector<1x128xf32> to vector<8x128xf32>
    %37 = arith.addf %34, %36 : vector<8x128xf32>
    %cst_18 = arith.constant 0.000000e+00 : f32
    %38 = vector.broadcast %cst_18 : f32 to vector<8x128xf32>
    %39 = arith.maximumf %37, %38 : vector<8x128xf32>
    %c0_19 = arith.constant 0 : index
    %c0_20 = arith.constant 0 : index
    %40 = vector.load %arg5[%c0_19, %c0_20] : memref<128x128xf32, #tpu.memory_space<vmem>>, vector<128x128xf32>
    %cst_21 = arith.constant dense<0.000000e+00> : vector<8x128xf32>
    %41 = tpu.matmul %39, %40, %cst_21 {dimension_numbers = #tpu.dot_dimension_numbers<[1], [0], [0], [1], [0, 0, 1, 1], [], []>} : vector<8x128xf32>, vector<128x128xf32>, vector<8x128xf32> -> vector<8x128xf32>
    %c0_22 = arith.constant 0 : index
    %c0_23 = arith.constant 0 : index
    %42 = vector.load %arg6[%c0_22, %c0_23] : memref<1x128xf32, #tpu.memory_space<vmem>>, vector<1x128xf32>
    %43 = vector.broadcast %42 : vector<1x128xf32> to vector<8x128xf32>
    %44 = arith.addf %41, %43 : vector<8x128xf32>
    %45 = vector.extract_strided_slice %44 {offsets = [0, 0], sizes = [8, 6], strides = [1, 1]} : vector<8x128xf32> to vector<8x6xf32>
    %c0_24 = arith.constant 0 : index
    %c0_25 = arith.constant 0 : index
    %46 = vector.load %arg7[%c0_24, %c0_25] : memref<8x6xf32, #tpu.memory_space<vmem>>, vector<8x6xf32>
    tpu.vector_store %arg7[%c0_24, %c0_25], %45 {strides = array<i32>} : memref<8x6xf32, #tpu.memory_space<vmem>>, vector<8x6xf32>,
    %47 = vector.extract_strided_slice %44 {offsets = [0, 6], sizes = [8, 1], strides = [1, 1]} : vector<8x128xf32> to vector<8x1xf32>
    %c0_26 = arith.constant 0 : index
    %c0_27 = arith.constant 0 : index
    %48 = vector.load %arg8[%c0_26, %c0_27] : memref<8x1xf32, #tpu.memory_space<vmem>>, vector<8x1xf32>
    tpu.vector_store %arg8[%c0_26, %c0_27], %47 {strides = array<i32>} : memref<8x1xf32, #tpu.memory_space<vmem>>, vector<8x1xf32>,
    return
  }
  func.func @transform_0(%arg0: i32) -> (i32, i32) {
    %c0_i32 = arith.constant 0 : i32
    %c0_i32_0 = arith.constant 0 : i32
    return %arg0, %c0_i32 : i32, i32
  }
  func.func @transform_1(%arg0: i32) -> (i32, i32) {
    %c0_i32 = arith.constant 0 : i32
    %c0_i32_0 = arith.constant 0 : i32
    %c0_i32_1 = arith.constant 0 : i32
    return %c0_i32, %c0_i32_0 : i32, i32
  }
  func.func @transform_2(%arg0: i32) -> (i32, i32, i32) {
    %c0_i32 = arith.constant 0 : i32
    %c0_i32_0 = arith.constant 0 : i32
    %c0_i32_1 = arith.constant 0 : i32
    %c0_i32_2 = arith.constant 0 : i32
    return %c0_i32, %c0_i32_0, %c0_i32_1 : i32, i32, i32
  }
  func.func @transform_3(%arg0: i32) -> (i32, i32) {
    %c0_i32 = arith.constant 0 : i32
    %c0_i32_0 = arith.constant 0 : i32
    %c0_i32_1 = arith.constant 0 : i32
    return %c0_i32, %c0_i32_0 : i32, i32
  }
  func.func @transform_4(%arg0: i32) -> (i32, i32) {
    %c0_i32 = arith.constant 0 : i32
    %c0_i32_0 = arith.constant 0 : i32
    %c0_i32_1 = arith.constant 0 : i32
    return %c0_i32, %c0_i32_0 : i32, i32
  }
  func.func @transform_5(%arg0: i32) -> (i32, i32) {
    %c0_i32 = arith.constant 0 : i32
    %c0_i32_0 = arith.constant 0 : i32
    %c0_i32_1 = arith.constant 0 : i32
    return %c0_i32, %c0_i32_0 : i32, i32
  }
  func.func @transform_6(%arg0: i32) -> (i32, i32) {
    %c0_i32 = arith.constant 0 : i32
    %c0_i32_0 = arith.constant 0 : i32
    return %arg0, %c0_i32 : i32, i32
  }
  func.func @transform_7(%arg0: i32) -> (i32, i32) {
    %c0_i32 = arith.constant 0 : i32
    %c0_i32_0 = arith.constant 0 : i32
    return %arg0, %c0_i32 : i32, i32
  }
}

module attributes {stable_mosaic.version = 11 : i64} {
  func.func @d2rl_kernel(%arg0: i32, %arg1: memref<8x16xf32, #tpu.memory_space<vmem>>, %arg2: memref<16x512xf32, #tpu.memory_space<vmem>>, %arg3: memref<3x128x128xf32, #tpu.memory_space<vmem>>, %arg4: memref<4x128xf32, #tpu.memory_space<vmem>>, %arg5: memref<128x128xf32, #tpu.memory_space<vmem>>, %arg6: memref<1x128xf32, #tpu.memory_space<vmem>>, %arg7: memref<8x6xf32, #tpu.memory_space<vmem>>, %arg8: memref<8x1xf32, #tpu.memory_space<vmem>>) attributes {dimension_semantics = [#tpu.dimension_semantics<parallel>], iteration_bounds = array<i64: 1>, scalar_prefetch = 0 : i64, scratch_operands = 0 : i64, tpu.core_type = #tpu.core_type<tc>, window_params = [{transform_indices = @transform_0, window_bounds = array<i64: 8, 16>}, {pipeline_mode = #tpu.pipeline_mode<synchronous>, transform_indices = @transform_1, window_bounds = array<i64: 16, 512>}, {pipeline_mode = #tpu.pipeline_mode<synchronous>, transform_indices = @transform_2, window_bounds = array<i64: 3, 128, 128>}, {pipeline_mode = #tpu.pipeline_mode<synchronous>, transform_indices = @transform_3, window_bounds = array<i64: 4, 128>}, {pipeline_mode = #tpu.pipeline_mode<synchronous>, transform_indices = @transform_4, window_bounds = array<i64: 128, 128>}, {pipeline_mode = #tpu.pipeline_mode<synchronous>, transform_indices = @transform_5, window_bounds = array<i64: 1, 128>}, {transform_indices = @transform_6, window_bounds = array<i64: 8, 6>}, {transform_indices = @transform_7, window_bounds = array<i64: 8, 1>}]} {
    %c0 = arith.constant 0 : index
    %c0_0 = arith.constant 0 : index
    %0 = vector.load %arg1[%c0, %c0_0] : memref<8x16xf32, #tpu.memory_space<vmem>>, vector<8x16xf32>
    %c0_1 = arith.constant 0 : index
    %c0_2 = arith.constant 0 : index
    %1 = vector.load %arg4[%c0_1, %c0_2] : memref<4x128xf32, #tpu.memory_space<vmem>>, vector<4x128xf32>
    %c0_3 = arith.constant 0 : index
    %c0_4 = arith.constant 0 : index
    %2 = vector.load %arg2[%c0_3, %c0_4] : memref<16x512xf32, #tpu.memory_space<vmem>>, vector<16x512xf32>
    %cst = arith.constant dense<0.000000e+00> : vector<8x512xf32>
    %3 = tpu.matmul %0, %2, %cst {dimension_numbers = #tpu.dot_dimension_numbers<[1], [0], [0], [1], [0, 0, 1, 1], [], []>} : vector<8x16xf32>, vector<16x512xf32>, vector<8x512xf32> -> vector<8x512xf32>
    %4 = vector.extract_strided_slice %3 {offsets = [0, 0], sizes = [8, 128], strides = [1, 1]} : vector<8x512xf32> to vector<8x128xf32>
    %5 = vector.extract_strided_slice %1 {offsets = [0, 0], sizes = [1, 128], strides = [1, 1]} : vector<4x128xf32> to vector<1x128xf32>
    %6 = vector.broadcast %5 : vector<1x128xf32> to vector<8x128xf32>
    %7 = arith.addf %4, %6 : vector<8x128xf32>
    %cst_5 = arith.constant 0.000000e+00 : f32
    %8 = vector.broadcast %cst_5 : f32 to vector<8x128xf32>
    %9 = arith.maximumf %7, %8 : vector<8x128xf32>
    %c0_6 = arith.constant 0 : index
    %c0_7 = arith.constant 0 : index
    %c0_8 = arith.constant 0 : index
    %10 = vector.load %arg3[%c0_6, %c0_7, %c0_8] : memref<3x128x128xf32, #tpu.memory_space<vmem>>, vector<1x128x128xf32>
    %11 = vector.shape_cast %10 : vector<1x128x128xf32> to vector<128x128xf32>
    %cst_9 = arith.constant dense<0.000000e+00> : vector<8x128xf32>
    %12 = tpu.matmul %9, %11, %cst_9 {dimension_numbers = #tpu.dot_dimension_numbers<[1], [0], [0], [1], [0, 0, 1, 1], [], []>} : vector<8x128xf32>, vector<128x128xf32>, vector<8x128xf32> -> vector<8x128xf32>
    %13 = vector.extract_strided_slice %3 {offsets = [0, 128], sizes = [8, 128], strides = [1, 1]} : vector<8x512xf32> to vector<8x128xf32>
    %14 = arith.addf %12, %13 : vector<8x128xf32>
    %15 = vector.extract_strided_slice %1 {offsets = [1, 0], sizes = [1, 128], strides = [1, 1]} : vector<4x128xf32> to vector<1x128xf32>
    %16 = vector.broadcast %15 : vector<1x128xf32> to vector<8x128xf32>
    %17 = arith.addf %14, %16 : vector<8x128xf32>
    %cst_10 = arith.constant 0.000000e+00 : f32
    %18 = vector.broadcast %cst_10 : f32 to vector<8x128xf32>
    %19 = arith.maximumf %17, %18 : vector<8x128xf32>
    %c1 = arith.constant 1 : index
    %c0_11 = arith.constant 0 : index
    %c0_12 = arith.constant 0 : index
    %20 = vector.load %arg3[%c1, %c0_11, %c0_12] : memref<3x128x128xf32, #tpu.memory_space<vmem>>, vector<1x128x128xf32>
    %21 = vector.shape_cast %20 : vector<1x128x128xf32> to vector<128x128xf32>
    %cst_13 = arith.constant dense<0.000000e+00> : vector<8x128xf32>
    %22 = tpu.matmul %19, %21, %cst_13 {dimension_numbers = #tpu.dot_dimension_numbers<[1], [0], [0], [1], [0, 0, 1, 1], [], []>} : vector<8x128xf32>, vector<128x128xf32>, vector<8x128xf32> -> vector<8x128xf32>
    %23 = vector.extract_strided_slice %3 {offsets = [0, 256], sizes = [8, 128], strides = [1, 1]} : vector<8x512xf32> to vector<8x128xf32>
    %24 = arith.addf %22, %23 : vector<8x128xf32>
    %25 = vector.extract_strided_slice %1 {offsets = [2, 0], sizes = [1, 128], strides = [1, 1]} : vector<4x128xf32> to vector<1x128xf32>
    %26 = vector.broadcast %25 : vector<1x128xf32> to vector<8x128xf32>
    %27 = arith.addf %24, %26 : vector<8x128xf32>
    %cst_14 = arith.constant 0.000000e+00 : f32
    %28 = vector.broadcast %cst_14 : f32 to vector<8x128xf32>
    %29 = arith.maximumf %27, %28 : vector<8x128xf32>
    %c2 = arith.constant 2 : index
    %c0_15 = arith.constant 0 : index
    %c0_16 = arith.constant 0 : index
    %30 = vector.load %arg3[%c2, %c0_15, %c0_16] : memref<3x128x128xf32, #tpu.memory_space<vmem>>, vector<1x128x128xf32>
    %31 = vector.shape_cast %30 : vector<1x128x128xf32> to vector<128x128xf32>
    %cst_17 = arith.constant dense<0.000000e+00> : vector<8x128xf32>
    %32 = tpu.matmul %29, %31, %cst_17 {dimension_numbers = #tpu.dot_dimension_numbers<[1], [0], [0], [1], [0, 0, 1, 1], [], []>} : vector<8x128xf32>, vector<128x128xf32>, vector<8x128xf32> -> vector<8x128xf32>
    %33 = vector.extract_strided_slice %3 {offsets = [0, 384], sizes = [8, 128], strides = [1, 1]} : vector<8x512xf32> to vector<8x128xf32>
    %34 = arith.addf %32, %33 : vector<8x128xf32>
    %35 = vector.extract_strided_slice %1 {offsets = [3, 0], sizes = [1, 128], strides = [1, 1]} : vector<4x128xf32> to vector<1x128xf32>
    %36 = vector.broadcast %35 : vector<1x128xf32> to vector<8x128xf32>
    %37 = arith.addf %34, %36 : vector<8x128xf32>
    %cst_18 = arith.constant 0.000000e+00 : f32
    %38 = vector.broadcast %cst_18 : f32 to vector<8x128xf32>
    %39 = arith.maximumf %37, %38 : vector<8x128xf32>
    %c0_19 = arith.constant 0 : index
    %c0_20 = arith.constant 0 : index
    %40 = vector.load %arg5[%c0_19, %c0_20] : memref<128x128xf32, #tpu.memory_space<vmem>>, vector<128x128xf32>
    %cst_21 = arith.constant dense<0.000000e+00> : vector<8x128xf32>
    %41 = tpu.matmul %39, %40, %cst_21 {dimension_numbers = #tpu.dot_dimension_numbers<[1], [0], [0], [1], [0, 0, 1, 1], [], []>} : vector<8x128xf32>, vector<128x128xf32>, vector<8x128xf32> -> vector<8x128xf32>
    %c0_22 = arith.constant 0 : index
    %c0_23 = arith.constant 0 : index
    %42 = vector.load %arg6[%c0_22, %c0_23] : memref<1x128xf32, #tpu.memory_space<vmem>>, vector<1x128xf32>
    %43 = vector.broadcast %42 : vector<1x128xf32> to vector<8x128xf32>
    %44 = arith.addf %41, %43 : vector<8x128xf32>
    %45 = vector.extract_strided_slice %44 {offsets = [0, 0], sizes = [8, 6], strides = [1, 1]} : vector<8x128xf32> to vector<8x6xf32>
    %c0_24 = arith.constant 0 : index
    %c0_25 = arith.constant 0 : index
    %46 = vector.load %arg7[%c0_24, %c0_25] : memref<8x6xf32, #tpu.memory_space<vmem>>, vector<8x6xf32>
    tpu.vector_store %arg7[%c0_24, %c0_25], %45 {strides = array<i32>} : memref<8x6xf32, #tpu.memory_space<vmem>>, vector<8x6xf32>,
    %47 = vector.extract_strided_slice %44 {offsets = [0, 6], sizes = [8, 1], strides = [1, 1]} : vector<8x128xf32> to vector<8x1xf32>
    %c0_26 = arith.constant 0 : index
    %c0_27 = arith.constant 0 : index
    %48 = vector.load %arg8[%c0_26, %c0_27] : memref<8x1xf32, #tpu.memory_space<vmem>>, vector<8x1xf32>
    tpu.vector_store %arg8[%c0_26, %c0_27], %47 {strides = array<i32>} : memref<8x1xf32, #tpu.memory_space<vmem>>, vector<8x1xf32>,
    return
  }
  func.func @transform_0(%arg0: i32) -> (i32, i32) {
    %c0_i32 = arith.constant 0 : i32
    %c0_i32_0 = arith.constant 0 : i32
    return %arg0, %c0_i32 : i32, i32
  }
  func.func @transform_1(%arg0: i32) -> (i32, i32) {
    %c0_i32 = arith.constant 0 : i32
    %c0_i32_0 = arith.constant 0 : i32
    %c0_i32_1 = arith.constant 0 : i32
    return %c0_i32, %c0_i32_0 : i32, i32
  }
  func.func @transform_2(%arg0: i32) -> (i32, i32, i32) {
    %c0_i32 = arith.constant 0 : i32
    %c0_i32_0 = arith.constant 0 : i32
    %c0_i32_1 = arith.constant 0 : i32
    %c0_i32_2 = arith.constant 0 : i32
    return %c0_i32, %c0_i32_0, %c0_i32_1 : i32, i32, i32
  }
  func.func @transform_3(%arg0: i32) -> (i32, i32) {
    %c0_i32 = arith.constant 0 : i32
    %c0_i32_0 = arith.constant 0 : i32
    %c0_i32_1 = arith.constant 0 : i32
    return %c0_i32, %c0_i32_0 : i32, i32
  }
  func.func @transform_4(%arg0: i32) -> (i32, i32) {
    %c0_i32 = arith.constant 0 : i32
    %c0_i32_0 = arith.constant 0 : i32
    %c0_i32_1 = arith.constant 0 : i32
    return %c0_i32, %c0_i32_0 : i32, i32
  }
  func.func @transform_5(%arg0: i32) -> (i32, i32) {
    %c0_i32 = arith.constant 0 : i32
    %c0_i32_0 = arith.constant 0 : i32
    %c0_i32_1 = arith.constant 0 : i32
    return %c0_i32, %c0_i32_0 : i32, i32
  }
  func.func @transform_6(%arg0: i32) -> (i32, i32) {
    %c0_i32 = arith.constant 0 : i32
    %c0_i32_0 = arith.constant 0 : i32
    return %arg0, %c0_i32 : i32, i32
  }
  func.func @transform_7(%arg0: i32) -> (i32, i32) {
    %c0_i32 = arith.constant 0 : i32
    %c0_i32_0 = arith.constant 0 : i32
    return %arg0, %c0_i32 : i32, i32
  }
}

</mosaic_0001>

<bundles_post_ra>
// kernel: d2rl_forward.1
= control target key start
LH: loop header
LB: loop body
LE: loop exit
PB: predicated region body
PF: predicated region fallthrough
CT: control target
= control target key end

     0   :  { %13 = vsyncpa [#allocation3], 0  ;;  %s1173_s0 = inlined_call_operand.hbm [shape: f32[8,16], index: 0, kind: input, shape index: {}]   ;;  %s1174_s1 = inlined_call_operand.hbm [shape: f32[16,512], index: 1, kind: input, shape index: {}]   ;;  %s1175_s2 = inlined_call_operand.hbm [shape: f32[3,128,128], index: 2, kind: input, shape index: {}]   ;;  %s1176_s3 = inlined_call_operand.hbm [shape: f32[4,128], index: 3, kind: input, shape index: {}]   ;;  %s1177_s4 = inlined_call_operand.hbm [shape: f32[128,128], index: 4, kind: input, shape index: {}]   ;;  %s1178_s5 = inlined_call_operand.vmem [shape: f32[1,128], index: 5, kind: input, shape index: {}]   ;;  %s1179_s6 = inlined_call_operand.hbm [shape: f32[8,6], index: 6, kind: output, shape index: {0}]   ;;  %s1180_s7 = inlined_call_operand.vmem [shape: f32[8,1], index: 7, kind: output, shape index: {1}]  }
   0x1   :  { %14 = vsyncpa [#allocation6], 0 }
   0x2   :  { %15 = vsyncpa [#allocation9], 0 }
   0x3   :  { %16 = vsyncpa [#allocation4], 0  ;;  %s1004_s24 = smov [#allocation5]  }
   0x4   :  { %s32_s25 = sshll.u32 %s1004_s24, 4  ;;  %s33_s25 = int_to_ptr.vmem [resolvable:$true] %s32_s25 }
   0x5   :  { %s884_s26 = scalar_lea.vmem %s33_s25, 1024  ;;  %p889_p1 = scmp.lt.s32.totalorder %s33_s25, %s33_s25 }
   0x6   :  { %p885_p0 = scmp.ne.s32.totalorder %s33_s25, %s884_s26  ;;  %p890_p2 = scmp.lt.s32.totalorder %s884_s26, %s884_s26 }
   0x8   :  { %p891_p3 = por %p890_p2, %p889_p1 }
   0xa   :  { %p892_p4 = pnand %p891_p3, %p885_p0 }
   0xc   :  { %895 = shalt.err (!%p892_p4)
}
   0xd   :  { %s1005_s27 = smov 512   ;;  %s1006_s28 = smov 32  }
   0xe   :  { %38 = dma.hbm_to_vmem [thread:$0]  %s1174_s1, 1024, %s33_s25, [#allocation6], %s1005_s27, %s1005_s27, %s1006_s28  }
   0xf   :  { %s1007_s8 = smov [#allocation8]   ;;  %s1008_s10 = smov [#allocation2]  }
  0x10   :  { %s57_s9 = sshll.u32 %s1007_s8, 4  ;;  %s23_s11 = sshll.u32 %s1008_s10, 4  ;;  %s58_s9 = int_to_ptr.vmem [resolvable:$true] %s57_s9  ;;  %s24_s11 = int_to_ptr.vmem [resolvable:$true] %s23_s11 }
  0x11   :  { %s904_s12 = scalar_lea.vmem %s58_s9, 64  ;;  %p909_p6 = scmp.lt.s32.totalorder %s58_s9, %s58_s9 }
  0x12   :  { %p905_p5 = scmp.ne.s32.totalorder %s58_s9, %s904_s12  ;;  %p910_p7 = scmp.lt.s32.totalorder %s904_s12, %s904_s12 }
  0x14   :  { %p911_p8 = por %p910_p7, %p909_p6 }
  0x16   :  { %p912_p9 = pnand %p911_p8, %p905_p5 }
  0x18   :  { %915 = shalt.err (!%p912_p9)
}
  0x19   :  { %60 = dma.hbm_to_vmem [thread:$0]  %s1176_s3, 64, %s58_s9, [#allocation9]  }
  0x1a   :  { %s924_s15 = scalar_lea.vmem %s24_s11, 128  ;;  %p929_p11 = scmp.lt.s32.totalorder %s24_s11, %s24_s11 }
  0x1b   :  { %p925_p10 = scmp.ne.s32.totalorder %s24_s11, %s924_s15  ;;  %p930_p12 = scmp.lt.s32.totalorder %s924_s15, %s924_s15 }
  0x1d   :  { %p931_p13 = por %p930_p12, %p929_p11 }
  0x1f   :  { %p932_p0 = pnand %p931_p13, %p925_p10 }
  0x21   :  { %935 = shalt.err (!%p932_p0)
}
  0x22   :  { %26 = dma.hbm_to_vmem [thread:$0]  %s1173_s0, 128, %s24_s11, [#allocation3]  }
  0x23   :  { %s1009_s17 = smov [#allocation7]  }
  0x24   :  { %s44_s18 = sshll.u32 %s1009_s17, 4  ;;  %s45_s18 = int_to_ptr.vmem [resolvable:$true] %s44_s18 }
  0x25   :  { %s944_s19 = scalar_lea.vmem %s45_s18, 6144  ;;  %p949_p2 = scmp.lt.s32.totalorder %s45_s18, %s45_s18 }
  0x26   :  { %p945_p1 = scmp.ne.s32.totalorder %s45_s18, %s944_s19  ;;  %p950_p3 = scmp.lt.s32.totalorder %s944_s19, %s944_s19 }
  0x28   :  { %p951_p4 = por %p950_p3, %p949_p2 }
  0x2a   :  { %p952_p5 = pnand %p951_p4, %p945_p1 }
  0x2c   :  { %955 = shalt.err (!%p952_p5)
}
  0x2d   :  { %s1010_s3 = smov 128   ;;  %s1011_s20 = smov 8  }
  0x2e   :  { %50 = dma.hbm_to_vmem [thread:$0]  %s1175_s2, 6144, %s45_s18, [#allocation6], %s1010_s3, %s1010_s3, %s1011_s20  }
  0x2f   :  { %s1012_s23 = smov [#allocation10]  }
  0x30   :  { %s66_s24 = sshll.u32 %s1012_s23, 4  ;;  %s67_s24 = int_to_ptr.vmem [resolvable:$true] %s66_s24 }
  0x31   :  { %s964_s0 = scalar_lea.vmem %s67_s24, 2048  ;;  %p969_p7 = scmp.lt.s32.totalorder %s67_s24, %s67_s24 }
  0x32   :  { %p965_p6 = scmp.ne.s32.totalorder %s67_s24, %s964_s0  ;;  %p970_p8 = scmp.lt.s32.totalorder %s964_s0, %s964_s0 }
  0x34   :  { %p971_p9 = por %p970_p8, %p969_p7 }
  0x36   :  { %p972_p10 = pnand %p971_p9, %p965_p6 }
  0x38   :  { %975 = shalt.err (!%p972_p10)
}
  0x39   :  { %72 = dma.hbm_to_vmem [thread:$0]  %s1177_s4, 2048, %s67_s24, [#allocation9], %s1010_s3, %s1010_s3, %s1011_s20  }
  0x3a   :  { %996 = dma.done.wait [#allocation3], 128  }
  0x3b   :  { %997 = vsyncadd [#allocation3], 4294967168 }
  0x3c   :  { %998 = dma.done.wait [#allocation6], 7168  }
  0x3d   :  { %999 = vsyncadd [#allocation6], 4294960128 }
  0x3e   :  { %1000 = dma.done.wait [#allocation9], 2112  }
  0x3f   :  { %1001 = vsyncadd [#allocation9], 4294965184  ;;  %v1013_v0 = vmov 0.0   ;;  %v97_v1 = vld [vmem:[#allocation5 + $0x28] sm:$0xff]  ;;  %v96_v2 = vld [vmem:[#allocation5 + $0x20] sm:$0xff]  ;;  %vm100_vm0 = vcmask 130048   ;;  %v246_v38 = vlaneseq }
  0x40   :  { %168 = vmatprep.mubr.f32.mxu0 %v1013_v0  ;;  %239 = vmatprep.mubr.f32.mxu1 %v1013_v0  ;;  %v93_v3 = vld [vmem:[#allocation5 + $0x8] sm:$0xff]  ;;  %v92_v4 = vld [vmem:[#allocation5] sm:$0xff]  ;;  %v1074_v5 = vld [vmem:[#allocation2] sm:$0xff]  ;;  %vm1014_vm1 = vmmov 0   ;;  %s1015_s27 = smov [#allocation11]   ;;  %vm623_vm2 = vcmask 48128  }
  0x41   :  { %132 = vmatprep.subr.mxu0 %v97_v1  ;;  %v267_v6 = vld [vmem:[#allocation7 + $0x78] sm:$0xff]  ;;  %v266_v7 = vld [vmem:[#allocation7 + $0x70] sm:$0xff]  ;;  %v265_v8 = vld [vmem:[#allocation7 + $0x68] sm:$0xff]  ;;  %v1114_v39 = vshrl.u32 %v246_v38, 7  ;;  %s637_s28 = sshll.u32 %s1015_s27, 4  ;;  %s1016_s29 = smov 122   ;;  %s638_s28 = int_to_ptr.vmem [resolvable:$true] %s637_s28 }
  0x42   :  { %133 = vmatpush1.msra.mxu0 %v96_v2  ;;  %v264_v9 = vld [vmem:[#allocation7 + $0x60] sm:$0xff]  ;;  %v263_v10 = vld [vmem:[#allocation7 + $0x58] sm:$0xff]  ;;  %v262_v11 = vld [vmem:[#allocation7 + $0x50] sm:$0xff]  ;;  %s976_s30 = scalar_lea.vmem %s638_s28, 128  ;;  %p981_p12 = scmp.lt.s32.totalorder %s638_s28, %s638_s28 }
  0x43   :  { %134 = vmatprep.subr.mxu0 %v93_v3  ;;  %v261_v12 = vld [vmem:[#allocation7 + $0x48] sm:$0xff]  ;;  %v260_v13 = vld [vmem:[#allocation7 + $0x40] sm:$0xff]  ;;  %v259_v14 = vld [vmem:[#allocation7 + $0x38] sm:$0xff]  ;;  %v248_v40 = vsub.s32 0, %v1114_v39  ;;  %v340_v62 = vsub.s32 1, %v1114_v39  ;;  %p977_p11 = scmp.ne.s32.totalorder %s638_s28, %s976_s30  ;;  %p982_p13 = scmp.lt.s32.totalorder %s976_s30, %s976_s30 }
  0x44   :  { %135 = vmatpush1.msra.mxu0 %v92_v4  ;;  %v258_v15 = vld [vmem:[#allocation7 + $0x30] sm:$0xff]  ;;  %v257_v16 = vld [vmem:[#allocation7 + $0x28] sm:$0xff]  ;;  %v256_v17 = vld [vmem:[#allocation7 + $0x20] sm:$0xff] }
  0x45   :  { %652 = vmatmul.mubr.msk.f32.vlgmr.msra.gmra.mxu0 %vm100_vm0, %v1074_v5  ;;  %723 = vmatprep.subr.mxu0 %v1013_v0  ;;  %v255_v18 = vld [vmem:[#allocation7 + $0x18] sm:$0xff]  ;;  %v254_v19 = vld [vmem:[#allocation7 + $0x10] sm:$0xff]  ;;  %v253_v20 = vld [vmem:[#allocation7 + $0x8] sm:$0xff]  ;;  %p983_p0 = por %p982_p13, %p981_p12 }
  0x46   :  { %724 = vmatpush3.msra.mxu0 %v267_v6  ;;  %v252_v21 = vld [vmem:[#allocation7] sm:$0xff]  ;;  %755 = vmatprep.mubr.msk.f32.mxu0 %vm1014_vm1, %v1013_v0  ;;  %v99_v22 = vld [vmem:[#allocation5 + $0x38] sm:$0xff]  ;;  %v98_v23 = vld [vmem:[#allocation5 + $0x30] sm:$0xff] }
  0x47   :  { %725 = vmatprep.subr.mxu0 %v1013_v0  ;;  %v95_v24 = vld [vmem:[#allocation5 + $0x18] sm:$0xff]  ;;  %203 = vmatprep.subr.mxu1 %v99_v22  ;;  %v94_v25 = vld [vmem:[#allocation5 + $0x10] sm:$0xff]  ;;  %v358_v28 = vld [vmem:[#allocation7 + $0xe8] sm:$0xff]  ;;  %p984_p1 = pnand %p983_p0, %p977_p11 }
  0x48   :  { %726 = vmatpush3.msra.mxu0 %v266_v7  ;;  %204 = vmatpush1.msra.mxu1 %v98_v23  ;;  %v360_v26 = vld [vmem:[#allocation7 + $0xf8] sm:$0xff]  ;;  %v359_v27 = vld [vmem:[#allocation7 + $0xf0] sm:$0xff]  ;;  %v357_v29 = vld [vmem:[#allocation7 + $0xe0] sm:$0xff] }
  0x49   :  { %727 = vmatprep.subr.mxu0 %v1013_v0  ;;  %205 = vmatprep.subr.mxu1 %v95_v24  ;;  %v356_v30 = vld [vmem:[#allocation7 + $0xd8] sm:$0xff]  ;;  %v355_v31 = vld [vmem:[#allocation7 + $0xd0] sm:$0xff]  ;;  %v354_v32 = vld [vmem:[#allocation7 + $0xc8] sm:$0xff]  ;;  %v433_v24 = vsub.s32 2, %v1114_v39 }
  0x4a   :  { %728 = vmatpush3.msra.mxu0 %v265_v8  ;;  %206 = vmatpush1.msra.mxu1 %v94_v25  ;;  %v353_v33 = vld [vmem:[#allocation7 + $0xc0] sm:$0xff]  ;;  %v352_v34 = vld [vmem:[#allocation7 + $0xb8] sm:$0xff]  ;;  %v351_v35 = vld [vmem:[#allocation7 + $0xb0] sm:$0xff] }
  0x4b   :  { %729 = vmatprep.subr.mxu0 %v1013_v0  ;;  %653 = vmatmul.mubr.msk.f32.vlgmr.msra.gmra.mxu1 %vm100_vm0, %v1074_v5  ;;  %v350_v36 = vld [vmem:[#allocation7 + $0xa8] sm:$0xff]  ;;  %v349_v37 = vld [vmem:[#allocation7 + $0xa0] sm:$0xff]  ;;  %v348_v46 = vld [vmem:[#allocation7 + $0x98] sm:$0xff] }
  0x4c   :  { %730 = vmatpush3.msra.mxu0 %v264_v9  ;;  %758 = vmatprep.subr.mxu1 %v1013_v0  ;;  %v1117_v41 = vld [vmem:[#allocation8] sm:$0xf]  ;;  %v347_v47 = vld [vmem:[#allocation7 + $0x90] sm:$0xff]  ;;  %v346_v48 = vld [vmem:[#allocation7 + $0x88] sm:$0xff] }
  0x4d   :  { %731 = vmatprep.subr.mxu0 %v1013_v0  ;;  %759 = vmatpush3.msra.mxu1 %v360_v26  ;;  %v249_v42 = vrot.slane %v1117_v41, %v248_v40  ;;  %v345_v49 = vld [vmem:[#allocation7 + $0x80] sm:$0xff]  ;;  %v453_v50 = vld [vmem:[#allocation7 + $0x178] sm:$0xff]  ;;  %v452_v51 = vld [vmem:[#allocation7 + $0x170] sm:$0xff]  ;;  %v341_v1 = vrot.slane %v1117_v41, %v340_v62  ;;  %v434_v26 = vrot.slane %v1117_v41, %v433_v24 }
  0x4e   :  { %732 = vmatpush3.msra.mxu0 %v263_v10  ;;  %790 = vmatprep.mubr.msk.f32.mxu1 %vm1014_vm1, %v1013_v0  ;;  %v451_v52 = vld [vmem:[#allocation7 + $0x168] sm:$0xff]  ;;  %v450_v53 = vld [vmem:[#allocation7 + $0x160] sm:$0xff]  ;;  %v449_v54 = vld [vmem:[#allocation7 + $0x158] sm:$0xff] }
  0x4f   :  { %733 = vmatprep.subr.mxu0 %v1013_v0  ;;  %760 = vmatprep.subr.mxu1 %v1013_v0  ;;  %v448_v55 = vld [vmem:[#allocation7 + $0x150] sm:$0xff]  ;;  %v447_v56 = vld [vmem:[#allocation7 + $0x148] sm:$0xff]  ;;  %v446_v57 = vld [vmem:[#allocation7 + $0x140] sm:$0xff] }
  0x50   :  { %734 = vmatpush3.msra.mxu0 %v262_v11  ;;  %761 = vmatpush3.msra.mxu1 %v359_v27  ;;  %v445_v58 = vld [vmem:[#allocation7 + $0x138] sm:$0xff]  ;;  %v444_v59 = vld [vmem:[#allocation7 + $0x130] sm:$0xff]  ;;  %v443_v60 = vld [vmem:[#allocation7 + $0x128] sm:$0xff] }
  0x51   :  { %735 = vmatprep.subr.mxu0 %v1013_v0  ;;  %762 = vmatprep.subr.mxu1 %v1013_v0  ;;  %v442_v61 = vld [vmem:[#allocation7 + $0x120] sm:$0xff]  ;;  %v441_v7 = vld [vmem:[#allocation7 + $0x118] sm:$0xff]  ;;  %v440_v8 = vld [vmem:[#allocation7 + $0x110] sm:$0xff] }
  0x52   :  { %736 = vmatpush3.msra.mxu0 %v261_v12  ;;  %763 = vmatpush3.msra.mxu1 %v358_v28  ;;  %v439_v9 = vld [vmem:[#allocation7 + $0x108] sm:$0xff]  ;;  %v438_v10 = vld [vmem:[#allocation7 + $0x100] sm:$0xff]  ;;  %v544_v12 = vld [vmem:[#allocation10 + $0x70] sm:$0xff] }
  0x53   :  { %737 = vmatprep.subr.mxu0 %v1013_v0  ;;  %764 = vmatprep.subr.mxu1 %v1013_v0  ;;  %v545_v11 = vld [vmem:[#allocation10 + $0x78] sm:$0xff]  ;;  %v534_v22 = vld [vmem:[#allocation10 + $0x20] sm:$0xff] }
  0x54   :  { %738 = vmatpush3.msra.mxu0 %v260_v13  ;;  %765 = vmatpush3.msra.mxu1 %v357_v29  ;;  %v543_v13 = vld [vmem:[#allocation10 + $0x68] sm:$0xff] }
  0x55   :  { %739 = vmatprep.subr.mxu0 %v1013_v0  ;;  %766 = vmatprep.subr.mxu1 %v1013_v0 }
  0x56   :  { %740 = vmatpush3.msra.mxu0 %v259_v14  ;;  %767 = vmatpush3.msra.mxu1 %v356_v30  ;;  %v542_v14 = vld [vmem:[#allocation10 + $0x60] sm:$0xff] }
  0x57   :  { %741 = vmatprep.subr.mxu0 %v1013_v0  ;;  %768 = vmatprep.subr.mxu1 %v1013_v0 }
  0x58   :  { %742 = vmatpush3.msra.mxu0 %v258_v15  ;;  %769 = vmatpush3.msra.mxu1 %v355_v31  ;;  %v541_v15 = vld [vmem:[#allocation10 + $0x58] sm:$0xff] }
  0x59   :  { %743 = vmatprep.subr.mxu0 %v1013_v0  ;;  %770 = vmatprep.subr.mxu1 %v1013_v0 }
  0x5a   :  { %744 = vmatpush3.msra.mxu0 %v257_v16  ;;  %771 = vmatpush3.msra.mxu1 %v354_v32  ;;  %v540_v16 = vld [vmem:[#allocation10 + $0x50] sm:$0xff]  ;;  %v533_v32 = vld [vmem:[#allocation10 + $0x18] sm:$0xff] }
  0x5b   :  { %745 = vmatprep.subr.mxu0 %v1013_v0  ;;  %772 = vmatprep.subr.mxu1 %v1013_v0 }
  0x5c   :  { %746 = vmatpush3.msra.mxu0 %v256_v17  ;;  %773 = vmatpush3.msra.mxu1 %v353_v33  ;;  %v539_v17 = vld [vmem:[#allocation10 + $0x48] sm:$0xff]  ;;  %v532_v33 = vld [vmem:[#allocation10 + $0x10] sm:$0xff] }
  0x5d   :  { %747 = vmatprep.subr.mxu0 %v1013_v0  ;;  %774 = vmatprep.subr.mxu1 %v1013_v0 }
  0x5e   :  { %748 = vmatpush3.msra.mxu0 %v255_v18  ;;  %775 = vmatpush3.msra.mxu1 %v352_v34  ;;  %v538_v18 = vld [vmem:[#allocation10 + $0x40] sm:$0xff]  ;;  %v531_v34 = vld [vmem:[#allocation10 + $0x8] sm:$0xff] }
  0x5f   :  { %749 = vmatprep.subr.mxu0 %v1013_v0  ;;  %776 = vmatprep.subr.mxu1 %v1013_v0 }
  0x60   :  { %750 = vmatpush3.msra.mxu0 %v254_v19  ;;  %777 = vmatpush3.msra.mxu1 %v351_v35  ;;  %v537_v19 = vld [vmem:[#allocation10 + $0x38] sm:$0xff]  ;;  %v530_v35 = vld [vmem:[#allocation10] sm:$0xff] }
  0x61   :  { %751 = vmatprep.subr.mxu0 %v1013_v0  ;;  %778 = vmatprep.subr.mxu1 %v1013_v0 }
  0x62   :  { %752 = vmatpush3.msra.mxu0 %v253_v20  ;;  %779 = vmatpush3.msra.mxu1 %v350_v36  ;;  %v536_v20 = vld [vmem:[#allocation10 + $0x30] sm:$0xff]  ;;  %v526_v36 = vsub.s32 3, %v1114_v39 }
  0x63   :  { %753 = vmatprep.subr.mxu0 %v1013_v0  ;;  %780 = vmatprep.subr.mxu1 %v1013_v0 }
  0x64   :  { %754 = vmatpush3.msra.mxu0 %v252_v21  ;;  %781 = vmatpush3.msra.mxu1 %v349_v37  ;;  %v535_v21 = vld [vmem:[#allocation10 + $0x28] sm:$0xff]  ;;  %v527_v37 = vrot.slane %v1117_v41, %v526_v36 }
  0x65   :  { %793 = vmatprep.subr.mxu0 %v1013_v0  ;;  %782 = vmatprep.subr.mxu1 %v1013_v0 }
  0x66   :  { %783 = vmatpush3.msra.mxu1 %v348_v46 }
  0x67   :  { %784 = vmatprep.subr.mxu1 %v1013_v0 }
  0x68   :  { %785 = vmatpush3.msra.mxu1 %v347_v47 }
  0x69   :  { %786 = vmatprep.subr.mxu1 %v1013_v0 }
  0x6a   :  { %787 = vmatpush3.msra.mxu1 %v346_v48 }
  0x6b   :  { %788 = vmatprep.subr.mxu1 %v1013_v0 }
  0x6c   :  { %789 = vmatpush3.msra.mxu1 %v345_v49 }
  0x6d   :  { %828 = vmatprep.subr.mxu1 %v1013_v0 }
 0x105   :  { %v170_v43 = vpop.f32.mrf.mxu0 }
 0x106   :  { %v250_v44 = vadd.f32 %v249_v42, %v170_v43 }
 0x107   :  { %v172_v63 = vpop.f32.mrf.mxu0 }
 0x108   :  { %v251_v45 = vmax.f32 %v250_v44, 0.0 }
 0x10a   :  { %756 = vmatmul.mubr.f32.vlgmr.msra.gmra.mxu0 %v251_v45  ;;  %v654_v45 = vld [vmem:[%s1178_s5] ss:$0 sm:$0xff] }
 0x10b   :  { %825 = vmatprep.mubr.msk.f32.mxu0 %vm1014_vm1, %v1013_v0  ;;  %794 = vmatpush3.msra.mxu0 %v453_v50  ;;  %v241_v23 = vpop.f32.mrf.mxu1 }
 0x10c   :  { %795 = vmatprep.subr.mxu0 %v1013_v0 }
 0x10d   :  { %796 = vmatpush3.msra.mxu0 %v452_v51  ;;  %v243_v25 = vpop.f32.mrf.mxu1 }
 0x10e   :  { %797 = vmatprep.subr.mxu0 %v1013_v0 }
 0x10f   :  { %798 = vmatpush3.msra.mxu0 %v451_v52 }
 0x110   :  { %799 = vmatprep.subr.mxu0 %v1013_v0 }
 0x111   :  { %800 = vmatpush3.msra.mxu0 %v450_v53 }
 0x112   :  { %801 = vmatprep.subr.mxu0 %v1013_v0 }
 0x113   :  { %802 = vmatpush3.msra.mxu0 %v449_v54 }
 0x114   :  { %803 = vmatprep.subr.mxu0 %v1013_v0 }
 0x115   :  { %804 = vmatpush3.msra.mxu0 %v448_v55 }
 0x116   :  { %805 = vmatprep.subr.mxu0 %v1013_v0 }
 0x117   :  { %806 = vmatpush3.msra.mxu0 %v447_v56 }
 0x118   :  { %807 = vmatprep.subr.mxu0 %v1013_v0 }
 0x119   :  { %808 = vmatpush3.msra.mxu0 %v446_v57 }
 0x11a   :  { %809 = vmatprep.subr.mxu0 %v1013_v0 }
 0x11b   :  { %810 = vmatpush3.msra.mxu0 %v445_v58 }
 0x11c   :  { %811 = vmatprep.subr.mxu0 %v1013_v0 }
 0x11d   :  { %812 = vmatpush3.msra.mxu0 %v444_v59 }
 0x11e   :  { %813 = vmatprep.subr.mxu0 %v1013_v0 }
 0x11f   :  { %814 = vmatpush3.msra.mxu0 %v443_v60 }
 0x120   :  { %815 = vmatprep.subr.mxu0 %v1013_v0 }
 0x121   :  { %816 = vmatpush3.msra.mxu0 %v442_v61 }
 0x122   :  { %817 = vmatprep.subr.mxu0 %v1013_v0 }
 0x123   :  { %818 = vmatpush3.msra.mxu0 %v441_v7 }
 0x124   :  { %819 = vmatprep.subr.mxu0 %v1013_v0 }
 0x125   :  { %820 = vmatpush3.msra.mxu0 %v440_v8 }
 0x126   :  { %821 = vmatprep.subr.mxu0 %v1013_v0 }
 0x127   :  { %822 = vmatpush3.msra.mxu0 %v439_v9 }
 0x128   :  { %823 = vmatprep.subr.mxu0 %v1013_v0 }
 0x129   :  { %824 = vmatpush3.msra.mxu0 %v438_v10 }
 0x1ca   :  { %v334_v2 = vpop.f32.mrf.mxu0 }
 0x1cb   :  { %v335_v3 = vadd.f32 %v334_v2, %v172_v63 }
 0x1cc   :  { %v757_v4 = vpop.f32.mrf.mxu0 }
 0x1cd   :  { %v342_v5 = vadd.f32 %v341_v1, %v335_v3 }
 0x1cf   :  { %v343_v6 = vmax.f32 %v342_v5, 0.0 }
 0x1d1   :  { %791 = vmatmul.mubr.f32.vlgmr.msra.gmra.mxu1 %v343_v6 }
 0x1d2   :  { %860 = vmatprep.mubr.msk.f32.mxu1 %vm1014_vm1, %v1013_v0  ;;  %829 = vmatpush3.msra.mxu1 %v545_v11 }
 0x1d3   :  { %830 = vmatprep.subr.mxu1 %v1013_v0 }
 0x1d4   :  { %831 = vmatpush3.msra.mxu1 %v544_v12 }
 0x1d5   :  { %832 = vmatprep.subr.mxu1 %v1013_v0 }
 0x1d6   :  { %833 = vmatpush3.msra.mxu1 %v543_v13 }
 0x1d7   :  { %834 = vmatprep.subr.mxu1 %v1013_v0 }
 0x1d8   :  { %835 = vmatpush3.msra.mxu1 %v542_v14 }
 0x1d9   :  { %836 = vmatprep.subr.mxu1 %v1013_v0 }
 0x1da   :  { %837 = vmatpush3.msra.mxu1 %v541_v15 }
 0x1db   :  { %838 = vmatprep.subr.mxu1 %v1013_v0 }
 0x1dc   :  { %839 = vmatpush3.msra.mxu1 %v540_v16 }
 0x1dd   :  { %840 = vmatprep.subr.mxu1 %v1013_v0 }
 0x1de   :  { %841 = vmatpush3.msra.mxu1 %v539_v17 }
 0x1df   :  { %842 = vmatprep.subr.mxu1 %v1013_v0 }
 0x1e0   :  { %843 = vmatpush3.msra.mxu1 %v538_v18 }
 0x1e1   :  { %844 = vmatprep.subr.mxu1 %v1013_v0 }
 0x1e2   :  { %845 = vmatpush3.msra.mxu1 %v537_v19 }
 0x1e3   :  { %846 = vmatprep.subr.mxu1 %v1013_v0 }
 0x1e4   :  { %847 = vmatpush3.msra.mxu1 %v536_v20 }
 0x1e5   :  { %848 = vmatprep.subr.mxu1 %v1013_v0 }
 0x1e6   :  { %849 = vmatpush3.msra.mxu1 %v535_v21 }
 0x1e7   :  { %850 = vmatprep.subr.mxu1 %v1013_v0 }
 0x1e8   :  { %851 = vmatpush3.msra.mxu1 %v534_v22 }
 0x1e9   :  { %852 = vmatprep.subr.mxu1 %v1013_v0 }
 0x1ea   :  { %853 = vmatpush3.msra.mxu1 %v533_v32 }
 0x1eb   :  { %854 = vmatprep.subr.mxu1 %v1013_v0 }
 0x1ec   :  { %855 = vmatpush3.msra.mxu1 %v532_v33 }
 0x1ed   :  { %856 = vmatprep.subr.mxu1 %v1013_v0 }
 0x1ee   :  { %857 = vmatpush3.msra.mxu1 %v531_v34 }
 0x1ef   :  { %858 = vmatprep.subr.mxu1 %v1013_v0 }
 0x1f0   :  { %859 = vmatpush3.msra.mxu1 %v530_v35 }
 0x291   :  { %v427_v27 = vpop.f32.mrf.mxu1 }
 0x292   :  { %v428_v28 = vadd.f32 %v427_v27, %v241_v23 }
 0x293   :  { %v792_v29 = vpop.f32.mrf.mxu1 }
 0x294   :  { %v435_v30 = vadd.f32 %v434_v26, %v428_v28 }
 0x296   :  { %v436_v31 = vmax.f32 %v435_v30, 0.0 }
 0x298   :  { %826 = vmatmul.mubr.f32.vlgmr.msra.gmra.mxu0 %v436_v31 }
 0x358   :  { %v520_v38 = vpop.f32.mrf.mxu0 }
 0x359   :  { %v521_v40 = vadd.f32 %v520_v38, %v243_v25 }
 0x35a   :  { %v827_v42 = vpop.f32.mrf.mxu0 }
 0x35b   :  { %v528_v43 = vadd.f32 %v527_v37, %v521_v40 }
 0x35d   :  { %v529_v44 = vmax.f32 %v528_v43, 0.0 }
 0x35f   :  { %861 = vmatmul.mubr.f32.vlgmr.msra.gmra.mxu1 %v529_v44 }
 0x41f   :  { %v619_v46 = vpop.f32.mrf.mxu1 }
 0x420   :  { %v620_v0 = vadd.f32 %v654_v45, %v619_v46 }
 0x421   :  { %v862_v47 = vpop.f32.mrf.mxu1 }
 0x422   :  { %626 = vrot.lane.b32.xlu0 %v620_v0, %s1016_s29  ;;  %624 = vst.msk [vmem:[#allocation11] sm:$0xff] %vm623_vm2, %v620_v0 }
 0x423   :  { %987 = shalt.err (!%p984_p1)
}
 0x424   :  { %640 = dma.vmem_to_hbm [thread:$0]  %s638_s28, 128, %s1179_s6, [#allocation4]   ;;  %vm629_vm3 = vcmask 7168  }
 0x494   :  { %v627_v39 = vpop.permute.xlu0 %626 }
 0x495   :  { %630 = vst.msk [vmem:[%s1180_s7] sm:$0xff] %vm629_vm3, %v627_v39 }
 0x496   :  { %1002 = dma.done.wait [#allocation4], 128  }
 0x497   :  { %1003 = vsyncadd [#allocation4], 4294967168 }
 0x498   :  { %648 = vsyncpa [#allocation3], 1 }
 0x499   :  { %649 = vsyncpa [#allocation6], 1 }
 0x49a   :  { %650 = vsyncpa [#allocation9], 1 }
 0x49b   :  { %651 = vsyncpa [#allocation4], 1 }

// kernel: d2rl_forward.1
= control target key start
LH: loop header
LB: loop body
LE: loop exit
PB: predicated region body
PF: predicated region fallthrough
CT: control target
= control target key end

     0   :  { %13 = vsyncpa [#allocation3], 0  ;;  %s1173_s0 = inlined_call_operand.hbm [shape: f32[8,16], index: 0, kind: input, shape index: {}]   ;;  %s1174_s1 = inlined_call_operand.hbm [shape: f32[16,512], index: 1, kind: input, shape index: {}]   ;;  %s1175_s2 = inlined_call_operand.hbm [shape: f32[3,128,128], index: 2, kind: input, shape index: {}]   ;;  %s1176_s3 = inlined_call_operand.hbm [shape: f32[4,128], index: 3, kind: input, shape index: {}]   ;;  %s1177_s4 = inlined_call_operand.hbm [shape: f32[128,128], index: 4, kind: input, shape index: {}]   ;;  %s1178_s5 = inlined_call_operand.vmem [shape: f32[1,128], index: 5, kind: input, shape index: {}]   ;;  %s1179_s6 = inlined_call_operand.hbm [shape: f32[8,6], index: 6, kind: output, shape index: {0}]   ;;  %s1180_s7 = inlined_call_operand.vmem [shape: f32[8,1], index: 7, kind: output, shape index: {1}]  }
   0x1   :  { %14 = vsyncpa [#allocation6], 0 }
   0x2   :  { %15 = vsyncpa [#allocation9], 0 }
   0x3   :  { %16 = vsyncpa [#allocation4], 0  ;;  %s1004_s24 = smov [#allocation5]  }
   0x4   :  { %s32_s25 = sshll.u32 %s1004_s24, 4  ;;  %s33_s25 = int_to_ptr.vmem [resolvable:$true] %s32_s25 }
   0x5   :  { %s884_s26 = scalar_lea.vmem %s33_s25, 1024  ;;  %p889_p1 = scmp.lt.s32.totalorder %s33_s25, %s33_s25 }
   0x6   :  { %p885_p0 = scmp.ne.s32.totalorder %s33_s25, %s884_s26  ;;  %p890_p2 = scmp.lt.s32.totalorder %s884_s26, %s884_s26 }
   0x8   :  { %p891_p3 = por %p890_p2, %p889_p1 }
   0xa   :  { %p892_p4 = pnand %p891_p3, %p885_p0 }
   0xc   :  { %895 = shalt.err (!%p892_p4)
}
   0xd   :  { %s1005_s27 = smov 512   ;;  %s1006_s28 = smov 32  }
   0xe   :  { %38 = dma.hbm_to_vmem [thread:$0]  %s1174_s1, 1024, %s33_s25, [#allocation6], %s1005_s27, %s1005_s27, %s1006_s28  }
   0xf   :  { %s1007_s8 = smov [#allocation8]   ;;  %s1008_s10 = smov [#allocation2]  }
  0x10   :  { %s57_s9 = sshll.u32 %s1007_s8, 4  ;;  %s23_s11 = sshll.u32 %s1008_s10, 4  ;;  %s58_s9 = int_to_ptr.vmem [resolvable:$true] %s57_s9  ;;  %s24_s11 = int_to_ptr.vmem [resolvable:$true] %s23_s11 }
  0x11   :  { %s904_s12 = scalar_lea.vmem %s58_s9, 64  ;;  %p909_p6 = scmp.lt.s32.totalorder %s58_s9, %s58_s9 }
  0x12   :  { %p905_p5 = scmp.ne.s32.totalorder %s58_s9, %s904_s12  ;;  %p910_p7 = scmp.lt.s32.totalorder %s904_s12, %s904_s12 }
  0x14   :  { %p911_p8 = por %p910_p7, %p909_p6 }
  0x16   :  { %p912_p9 = pnand %p911_p8, %p905_p5 }
  0x18   :  { %915 = shalt.err (!%p912_p9)
}
  0x19   :  { %60 = dma.hbm_to_vmem [thread:$0]  %s1176_s3, 64, %s58_s9, [#allocation9]  }
  0x1a   :  { %s924_s15 = scalar_lea.vmem %s24_s11, 128  ;;  %p929_p11 = scmp.lt.s32.totalorder %s24_s11, %s24_s11 }
  0x1b   :  { %p925_p10 = scmp.ne.s32.totalorder %s24_s11, %s924_s15  ;;  %p930_p12 = scmp.lt.s32.totalorder %s924_s15, %s924_s15 }
  0x1d   :  { %p931_p13 = por %p930_p12, %p929_p11 }
  0x1f   :  { %p932_p0 = pnand %p931_p13, %p925_p10 }
  0x21   :  { %935 = shalt.err (!%p932_p0)
}
  0x22   :  { %26 = dma.hbm_to_vmem [thread:$0]  %s1173_s0, 128, %s24_s11, [#allocation3]  }
  0x23   :  { %s1009_s17 = smov [#allocation7]  }
  0x24   :  { %s44_s18 = sshll.u32 %s1009_s17, 4  ;;  %s45_s18 = int_to_ptr.vmem [resolvable:$true] %s44_s18 }
  0x25   :  { %s944_s19 = scalar_lea.vmem %s45_s18, 6144  ;;  %p949_p2 = scmp.lt.s32.totalorder %s45_s18, %s45_s18 }
  0x26   :  { %p945_p1 = scmp.ne.s32.totalorder %s45_s18, %s944_s19  ;;  %p950_p3 = scmp.lt.s32.totalorder %s944_s19, %s944_s19 }
  0x28   :  { %p951_p4 = por %p950_p3, %p949_p2 }
  0x2a   :  { %p952_p5 = pnand %p951_p4, %p945_p1 }
  0x2c   :  { %955 = shalt.err (!%p952_p5)
}
  0x2d   :  { %s1010_s3 = smov 128   ;;  %s1011_s20 = smov 8  }
  0x2e   :  { %50 = dma.hbm_to_vmem [thread:$0]  %s1175_s2, 6144, %s45_s18, [#allocation6], %s1010_s3, %s1010_s3, %s1011_s20  }
  0x2f   :  { %s1012_s23 = smov [#allocation10]  }
  0x30   :  { %s66_s24 = sshll.u32 %s1012_s23, 4  ;;  %s67_s24 = int_to_ptr.vmem [resolvable:$true] %s66_s24 }
  0x31   :  { %s964_s0 = scalar_lea.vmem %s67_s24, 2048  ;;  %p969_p7 = scmp.lt.s32.totalorder %s67_s24, %s67_s24 }
  0x32   :  { %p965_p6 = scmp.ne.s32.totalorder %s67_s24, %s964_s0  ;;  %p970_p8 = scmp.lt.s32.totalorder %s964_s0, %s964_s0 }
  0x34   :  { %p971_p9 = por %p970_p8, %p969_p7 }
  0x36   :  { %p972_p10 = pnand %p971_p9, %p965_p6 }
  0x38   :  { %975 = shalt.err (!%p972_p10)
}
  0x39   :  { %72 = dma.hbm_to_vmem [thread:$0]  %s1177_s4, 2048, %s67_s24, [#allocation9], %s1010_s3, %s1010_s3, %s1011_s20  }
  0x3a   :  { %996 = dma.done.wait [#allocation3], 128  }
  0x3b   :  { %997 = vsyncadd [#allocation3], 4294967168 }
  0x3c   :  { %998 = dma.done.wait [#allocation6], 7168  }
  0x3d   :  { %999 = vsyncadd [#allocation6], 4294960128 }
  0x3e   :  { %1000 = dma.done.wait [#allocation9], 2112  }
  0x3f   :  { %1001 = vsyncadd [#allocation9], 4294965184  ;;  %v1013_v0 = vmov 0.0   ;;  %v97_v1 = vld [vmem:[#allocation5 + $0x28] sm:$0xff]  ;;  %v96_v2 = vld [vmem:[#allocation5 + $0x20] sm:$0xff]  ;;  %vm100_vm0 = vcmask 130048   ;;  %v246_v38 = vlaneseq }
  0x40   :  { %168 = vmatprep.mubr.f32.mxu0 %v1013_v0  ;;  %239 = vmatprep.mubr.f32.mxu1 %v1013_v0  ;;  %v93_v3 = vld [vmem:[#allocation5 + $0x8] sm:$0xff]  ;;  %v92_v4 = vld [vmem:[#allocation5] sm:$0xff]  ;;  %v1074_v5 = vld [vmem:[#allocation2] sm:$0xff]  ;;  %vm1014_vm1 = vmmov 0   ;;  %s1015_s27 = smov [#allocation11]   ;;  %vm623_vm2 = vcmask 48128  }
  0x41   :  { %132 = vmatprep.subr.mxu0 %v97_v1  ;;  %v267_v6 = vld [vmem:[#allocation7 + $0x78] sm:$0xff]  ;;  %v266_v7 = vld [vmem:[#allocation7 + $0x70] sm:$0xff]  ;;  %v265_v8 = vld [vmem:[#allocation7 + $0x68] sm:$0xff]  ;;  %v1114_v39 = vshrl.u32 %v246_v38, 7  ;;  %s637_s28 = sshll.u32 %s1015_s27, 4  ;;  %s1016_s29 = smov 122   ;;  %s638_s28 = int_to_ptr.vmem [resolvable:$true] %s637_s28 }
  0x42   :  { %133 = vmatpush1.msra.mxu0 %v96_v2  ;;  %v264_v9 = vld [vmem:[#allocation7 + $0x60] sm:$0xff]  ;;  %v263_v10 = vld [vmem:[#allocation7 + $0x58] sm:$0xff]  ;;  %v262_v11 = vld [vmem:[#allocation7 + $0x50] sm:$0xff]  ;;  %s976_s30 = scalar_lea.vmem %s638_s28, 128  ;;  %p981_p12 = scmp.lt.s32.totalorder %s638_s28, %s638_s28 }
  0x43   :  { %134 = vmatprep.subr.mxu0 %v93_v3  ;;  %v261_v12 = vld [vmem:[#allocation7 + $0x48] sm:$0xff]  ;;  %v260_v13 = vld [vmem:[#allocation7 + $0x40] sm:$0xff]  ;;  %v259_v14 = vld [vmem:[#allocation7 + $0x38] sm:$0xff]  ;;  %v248_v40 = vsub.s32 0, %v1114_v39  ;;  %v340_v62 = vsub.s32 1, %v1114_v39  ;;  %p977_p11 = scmp.ne.s32.totalorder %s638_s28, %s976_s30  ;;  %p982_p13 = scmp.lt.s32.totalorder %s976_s30, %s976_s30 }
  0x44   :  { %135 = vmatpush1.msra.mxu0 %v92_v4  ;;  %v258_v15 = vld [vmem:[#allocation7 + $0x30] sm:$0xff]  ;;  %v257_v16 = vld [vmem:[#allocation7 + $0x28] sm:$0xff]  ;;  %v256_v17 = vld [vmem:[#allocation7 + $0x20] sm:$0xff] }
  0x45   :  { %652 = vmatmul.mubr.msk.f32.vlgmr.msra.gmra.mxu0 %vm100_vm0, %v1074_v5  ;;  %723 = vmatprep.subr.mxu0 %v1013_v0  ;;  %v255_v18 = vld [vmem:[#allocation7 + $0x18] sm:$0xff]  ;;  %v254_v19 = vld [vmem:[#allocation7 + $0x10] sm:$0xff]  ;;  %v253_v20 = vld [vmem:[#allocation7 + $0x8] sm:$0xff]  ;;  %p983_p0 = por %p982_p13, %p981_p12 }
  0x46   :  { %724 = vmatpush3.msra.mxu0 %v267_v6  ;;  %v252_v21 = vld [vmem:[#allocation7] sm:$0xff]  ;;  %755 = vmatprep.mubr.msk.f32.mxu0 %vm1014_vm1, %v1013_v0  ;;  %v99_v22 = vld [vmem:[#allocation5 + $0x38] sm:$0xff]  ;;  %v98_v23 = vld [vmem:[#allocation5 + $0x30] sm:$0xff] }
  0x47   :  { %725 = vmatprep.subr.mxu0 %v1013_v0  ;;  %v95_v24 = vld [vmem:[#allocation5 + $0x18] sm:$0xff]  ;;  %203 = vmatprep.subr.mxu1 %v99_v22  ;;  %v94_v25 = vld [vmem:[#allocation5 + $0x10] sm:$0xff]  ;;  %v358_v28 = vld [vmem:[#allocation7 + $0xe8] sm:$0xff]  ;;  %p984_p1 = pnand %p983_p0, %p977_p11 }
  0x48   :  { %726 = vmatpush3.msra.mxu0 %v266_v7  ;;  %204 = vmatpush1.msra.mxu1 %v98_v23  ;;  %v360_v26 = vld [vmem:[#allocation7 + $0xf8] sm:$0xff]  ;;  %v359_v27 = vld [vmem:[#allocation7 + $0xf0] sm:$0xff]  ;;  %v357_v29 = vld [vmem:[#allocation7 + $0xe0] sm:$0xff] }
  0x49   :  { %727 = vmatprep.subr.mxu0 %v1013_v0  ;;  %205 = vmatprep.subr.mxu1 %v95_v24  ;;  %v356_v30 = vld [vmem:[#allocation7 + $0xd8] sm:$0xff]  ;;  %v355_v31 = vld [vmem:[#allocation7 + $0xd0] sm:$0xff]  ;;  %v354_v32 = vld [vmem:[#allocation7 + $0xc8] sm:$0xff]  ;;  %v433_v24 = vsub.s32 2, %v1114_v39 }
  0x4a   :  { %728 = vmatpush3.msra.mxu0 %v265_v8  ;;  %206 = vmatpush1.msra.mxu1 %v94_v25  ;;  %v353_v33 = vld [vmem:[#allocation7 + $0xc0] sm:$0xff]  ;;  %v352_v34 = vld [vmem:[#allocation7 + $0xb8] sm:$0xff]  ;;  %v351_v35 = vld [vmem:[#allocation7 + $0xb0] sm:$0xff] }
  0x4b   :  { %729 = vmatprep.subr.mxu0 %v1013_v0  ;;  %653 = vmatmul.mubr.msk.f32.vlgmr.msra.gmra.mxu1 %vm100_vm0, %v1074_v5  ;;  %v350_v36 = vld [vmem:[#allocation7 + $0xa8] sm:$0xff]  ;;  %v349_v37 = vld [vmem:[#allocation7 + $0xa0] sm:$0xff]  ;;  %v348_v46 = vld [vmem:[#allocation7 + $0x98] sm:$0xff] }
  0x4c   :  { %730 = vmatpush3.msra.mxu0 %v264_v9  ;;  %758 = vmatprep.subr.mxu1 %v1013_v0  ;;  %v1117_v41 = vld [vmem:[#allocation8] sm:$0xf]  ;;  %v347_v47 = vld [vmem:[#allocation7 + $0x90] sm:$0xff]  ;;  %v346_v48 = vld [vmem:[#allocation7 + $0x88] sm:$0xff] }
  0x4d   :  { %731 = vmatprep.subr.mxu0 %v1013_v0  ;;  %759 = vmatpush3.msra.mxu1 %v360_v26  ;;  %v249_v42 = vrot.slane %v1117_v41, %v248_v40  ;;  %v345_v49 = vld [vmem:[#allocation7 + $0x80] sm:$0xff]  ;;  %v453_v50 = vld [vmem:[#allocation7 + $0x178] sm:$0xff]  ;;  %v452_v51 = vld [vmem:[#allocation7 + $0x170] sm:$0xff]  ;;  %v341_v1 = vrot.slane %v1117_v41, %v340_v62  ;;  %v434_v26 = vrot.slane %v1117_v41, %v433_v24 }
  0x4e   :  { %732 = vmatpush3.msra.mxu0 %v263_v10  ;;  %790 = vmatprep.mubr.msk.f32.mxu1 %vm1014_vm1, %v1013_v0  ;;  %v451_v52 = vld [vmem:[#allocation7 + $0x168] sm:$0xff]  ;;  %v450_v53 = vld [vmem:[#allocation7 + $0x160] sm:$0xff]  ;;  %v449_v54 = vld [vmem:[#allocation7 + $0x158] sm:$0xff] }
  0x4f   :  { %733 = vmatprep.subr.mxu0 %v1013_v0  ;;  %760 = vmatprep.subr.mxu1 %v1013_v0  ;;  %v448_v55 = vld [vmem:[#allocation7 + $0x150] sm:$0xff]  ;;  %v447_v56 = vld [vmem:[#allocation7 + $0x148] sm:$0xff]  ;;  %v446_v57 = vld [vmem:[#allocation7 + $0x140] sm:$0xff] }
  0x50   :  { %734 = vmatpush3.msra.mxu0 %v262_v11  ;;  %761 = vmatpush3.msra.mxu1 %v359_v27  ;;  %v445_v58 = vld [vmem:[#allocation7 + $0x138] sm:$0xff]  ;;  %v444_v59 = vld [vmem:[#allocation7 + $0x130] sm:$0xff]  ;;  %v443_v60 = vld [vmem:[#allocation7 + $0x128] sm:$0xff] }
  0x51   :  { %735 = vmatprep.subr.mxu0 %v1013_v0  ;;  %762 = vmatprep.subr.mxu1 %v1013_v0  ;;  %v442_v61 = vld [vmem:[#allocation7 + $0x120] sm:$0xff]  ;;  %v441_v7 = vld [vmem:[#allocation7 + $0x118] sm:$0xff]  ;;  %v440_v8 = vld [vmem:[#allocation7 + $0x110] sm:$0xff] }
  0x52   :  { %736 = vmatpush3.msra.mxu0 %v261_v12  ;;  %763 = vmatpush3.msra.mxu1 %v358_v28  ;;  %v439_v9 = vld [vmem:[#allocation7 + $0x108] sm:$0xff]  ;;  %v438_v10 = vld [vmem:[#allocation7 + $0x100] sm:$0xff]  ;;  %v544_v12 = vld [vmem:[#allocation10 + $0x70] sm:$0xff] }
  0x53   :  { %737 = vmatprep.subr.mxu0 %v1013_v0  ;;  %764 = vmatprep.subr.mxu1 %v1013_v0  ;;  %v545_v11 = vld [vmem:[#allocation10 + $0x78] sm:$0xff]  ;;  %v534_v22 = vld [vmem:[#allocation10 + $0x20] sm:$0xff] }
  0x54   :  { %738 = vmatpush3.msra.mxu0 %v260_v13  ;;  %765 = vmatpush3.msra.mxu1 %v357_v29  ;;  %v543_v13 = vld [vmem:[#allocation10 + $0x68] sm:$0xff] }
  0x55   :  { %739 = vmatprep.subr.mxu0 %v1013_v0  ;;  %766 = vmatprep.subr.mxu1 %v1013_v0 }
  0x56   :  { %740 = vmatpush3.msra.mxu0 %v259_v14  ;;  %767 = vmatpush3.msra.mxu1 %v356_v30  ;;  %v542_v14 = vld [vmem:[#allocation10 + $0x60] sm:$0xff] }
  0x57   :  { %741 = vmatprep.subr.mxu0 %v1013_v0  ;;  %768 = vmatprep.subr.mxu1 %v1013_v0 }
  0x58   :  { %742 = vmatpush3.msra.mxu0 %v258_v15  ;;  %769 = vmatpush3.msra.mxu1 %v355_v31  ;;  %v541_v15 = vld [vmem:[#allocation10 + $0x58] sm:$0xff] }
  0x59   :  { %743 = vmatprep.subr.mxu0 %v1013_v0  ;;  %770 = vmatprep.subr.mxu1 %v1013_v0 }
  0x5a   :  { %744 = vmatpush3.msra.mxu0 %v257_v16  ;;  %771 = vmatpush3.msra.mxu1 %v354_v32  ;;  %v540_v16 = vld [vmem:[#allocation10 + $0x50] sm:$0xff]  ;;  %v533_v32 = vld [vmem:[#allocation10 + $0x18] sm:$0xff] }
  0x5b   :  { %745 = vmatprep.subr.mxu0 %v1013_v0  ;;  %772 = vmatprep.subr.mxu1 %v1013_v0 }
  0x5c   :  { %746 = vmatpush3.msra.mxu0 %v256_v17  ;;  %773 = vmatpush3.msra.mxu1 %v353_v33  ;;  %v539_v17 = vld [vmem:[#allocation10 + $0x48] sm:$0xff]  ;;  %v532_v33 = vld [vmem:[#allocation10 + $0x10] sm:$0xff] }
  0x5d   :  { %747 = vmatprep.subr.mxu0 %v1013_v0  ;;  %774 = vmatprep.subr.mxu1 %v1013_v0 }
  0x5e   :  { %748 = vmatpush3.msra.mxu0 %v255_v18  ;;  %775 = vmatpush3.msra.mxu1 %v352_v34  ;;  %v538_v18 = vld [vmem:[#allocation10 + $0x40] sm:$0xff]  ;;  %v531_v34 = vld [vmem:[#allocation10 + $0x8] sm:$0xff] }
  0x5f   :  { %749 = vmatprep.subr.mxu0 %v1013_v0  ;;  %776 = vmatprep.subr.mxu1 %v1013_v0 }
  0x60   :  { %750 = vmatpush3.msra.mxu0 %v254_v19  ;;  %777 = vmatpush3.msra.mxu1 %v351_v35  ;;  %v537_v19 = vld [vmem:[#allocation10 + $0x38] sm:$0xff]  ;;  %v530_v35 = vld [vmem:[#allocation10] sm:$0xff] }
  0x61   :  { %751 = vmatprep.subr.mxu0 %v1013_v0  ;;  %778 = vmatprep.subr.mxu1 %v1013_v0 }
  0x62   :  { %752 = vmatpush3.msra.mxu0 %v253_v20  ;;  %779 = vmatpush3.msra.mxu1 %v350_v36  ;;  %v536_v20 = vld [vmem:[#allocation10 + $0x30] sm:$0xff]  ;;  %v526_v36 = vsub.s32 3, %v1114_v39 }
  0x63   :  { %753 = vmatprep.subr.mxu0 %v1013_v0  ;;  %780 = vmatprep.subr.mxu1 %v1013_v0 }
  0x64   :  { %754 = vmatpush3.msra.mxu0 %v252_v21  ;;  %781 = vmatpush3.msra.mxu1 %v349_v37  ;;  %v535_v21 = vld [vmem:[#allocation10 + $0x28] sm:$0xff]  ;;  %v527_v37 = vrot.slane %v1117_v41, %v526_v36 }
  0x65   :  { %793 = vmatprep.subr.mxu0 %v1013_v0  ;;  %782 = vmatprep.subr.mxu1 %v1013_v0 }
  0x66   :  { %783 = vmatpush3.msra.mxu1 %v348_v46 }
  0x67   :  { %784 = vmatprep.subr.mxu1 %v1013_v0 }
  0x68   :  { %785 = vmatpush3.msra.mxu1 %v347_v47 }
  0x69   :  { %786 = vmatprep.subr.mxu1 %v1013_v0 }
  0x6a   :  { %787 = vmatpush3.msra.mxu1 %v346_v48 }
  0x6b   :  { %788 = vmatprep.subr.mxu1 %v1013_v0 }
  0x6c   :  { %789 = vmatpush3.msra.mxu1 %v345_v49 }
  0x6d   :  { %828 = vmatprep.subr.mxu1 %v1013_v0 }
 0x105   :  { %v170_v43 = vpop.f32.mrf.mxu0 }
 0x106   :  { %v250_v44 = vadd.f32 %v249_v42, %v170_v43 }
 0x107   :  { %v172_v63 = vpop.f32.mrf.mxu0 }
 0x108   :  { %v251_v45 = vmax.f32 %v250_v44, 0.0 }
 0x10a   :  { %756 = vmatmul.mubr.f32.vlgmr.msra.gmra.mxu0 %v251_v45  ;;  %v654_v45 = vld [vmem:[%s1178_s5] ss:$0 sm:$0xff] }
 0x10b   :  { %825 = vmatprep.mubr.msk.f32.mxu0 %vm1014_vm1, %v1013_v0  ;;  %794 = vmatpush3.msra.mxu0 %v453_v50  ;;  %v241_v23 = vpop.f32.mrf.mxu1 }
 0x10c   :  { %795 = vmatprep.subr.mxu0 %v1013_v0 }
 0x10d   :  { %796 = vmatpush3.msra.mxu0 %v452_v51  ;;  %v243_v25 = vpop.f32.mrf.mxu1 }
 0x10e   :  { %797 = vmatprep.subr.mxu0 %v1013_v0 }
 0x10f   :  { %798 = vmatpush3.msra.mxu0 %v451_v52 }
 0x110   :  { %799 = vmatprep.subr.mxu0 %v1013_v0 }
 0x111   :  { %800 = vmatpush3.msra.mxu0 %v450_v53 }
 0x112   :  { %801 = vmatprep.subr.mxu0 %v1013_v0 }
 0x113   :  { %802 = vmatpush3.msra.mxu0 %v449_v54 }
 0x114   :  { %803 = vmatprep.subr.mxu0 %v1013_v0 }
 0x115   :  { %804 = vmatpush3.msra.mxu0 %v448_v55 }
 0x116   :  { %805 = vmatprep.subr.mxu0 %v1013_v0 }
 0x117   :  { %806 = vmatpush3.msra.mxu0 %v447_v56 }
 0x118   :  { %807 = vmatprep.subr.mxu0 %v1013_v0 }
 0x119   :  { %808 = vmatpush3.msra.mxu0 %v446_v57 }
 0x11a   :  { %809 = vmatprep.subr.mxu0 %v1013_v0 }
 0x11b   :  { %810 = vmatpush3.msra.mxu0 %v445_v58 }
 0x11c   :  { %811 = vmatprep.subr.mxu0 %v1013_v0 }
 0x11d   :  { %812 = vmatpush3.msra.mxu0 %v444_v59 }
 0x11e   :  { %813 = vmatprep.subr.mxu0 %v1013_v0 }
 0x11f   :  { %814 = vmatpush3.msra.mxu0 %v443_v60 }
 0x120   :  { %815 = vmatprep.subr.mxu0 %v1013_v0 }
 0x121   :  { %816 = vmatpush3.msra.mxu0 %v442_v61 }
 0x122   :  { %817 = vmatprep.subr.mxu0 %v1013_v0 }
 0x123   :  { %818 = vmatpush3.msra.mxu0 %v441_v7 }
 0x124   :  { %819 = vmatprep.subr.mxu0 %v1013_v0 }
 0x125   :  { %820 = vmatpush3.msra.mxu0 %v440_v8 }
 0x126   :  { %821 = vmatprep.subr.mxu0 %v1013_v0 }
 0x127   :  { %822 = vmatpush3.msra.mxu0 %v439_v9 }
 0x128   :  { %823 = vmatprep.subr.mxu0 %v1013_v0 }
 0x129   :  { %824 = vmatpush3.msra.mxu0 %v438_v10 }
 0x1ca   :  { %v334_v2 = vpop.f32.mrf.mxu0 }
 0x1cb   :  { %v335_v3 = vadd.f32 %v334_v2, %v172_v63 }
 0x1cc   :  { %v757_v4 = vpop.f32.mrf.mxu0 }
 0x1cd   :  { %v342_v5 = vadd.f32 %v341_v1, %v335_v3 }
 0x1cf   :  { %v343_v6 = vmax.f32 %v342_v5, 0.0 }
 0x1d1   :  { %791 = vmatmul.mubr.f32.vlgmr.msra.gmra.mxu1 %v343_v6 }
 0x1d2   :  { %860 = vmatprep.mubr.msk.f32.mxu1 %vm1014_vm1, %v1013_v0  ;;  %829 = vmatpush3.msra.mxu1 %v545_v11 }
 0x1d3   :  { %830 = vmatprep.subr.mxu1 %v1013_v0 }
 0x1d4   :  { %831 = vmatpush3.msra.mxu1 %v544_v12 }
 0x1d5   :  { %832 = vmatprep.subr.mxu1 %v1013_v0 }
 0x1d6   :  { %833 = vmatpush3.msra.mxu1 %v543_v13 }
 0x1d7   :  { %834 = vmatprep.subr.mxu1 %v1013_v0 }
 0x1d8   :  { %835 = vmatpush3.msra.mxu1 %v542_v14 }
 0x1d9   :  { %836 = vmatprep.subr.mxu1 %v1013_v0 }
 0x1da   :  { %837 = vmatpush3.msra.mxu1 %v541_v15 }
 0x1db   :  { %838 = vmatprep.subr.mxu1 %v1013_v0 }
 0x1dc   :  { %839 = vmatpush3.msra.mxu1 %v540_v16 }
 0x1dd   :  { %840 = vmatprep.subr.mxu1 %v1013_v0 }
 0x1de   :  { %841 = vmatpush3.msra.mxu1 %v539_v17 }
 0x1df   :  { %842 = vmatprep.subr.mxu1 %v1013_v0 }
 0x1e0   :  { %843 = vmatpush3.msra.mxu1 %v538_v18 }
 0x1e1   :  { %844 = vmatprep.subr.mxu1 %v1013_v0 }
 0x1e2   :  { %845 = vmatpush3.msra.mxu1 %v537_v19 }
 0x1e3   :  { %846 = vmatprep.subr.mxu1 %v1013_v0 }
 0x1e4   :  { %847 = vmatpush3.msra.mxu1 %v536_v20 }
 0x1e5   :  { %848 = vmatprep.subr.mxu1 %v1013_v0 }
 0x1e6   :  { %849 = vmatpush3.msra.mxu1 %v535_v21 }
 0x1e7   :  { %850 = vmatprep.subr.mxu1 %v1013_v0 }
 0x1e8   :  { %851 = vmatpush3.msra.mxu1 %v534_v22 }
 0x1e9   :  { %852 = vmatprep.subr.mxu1 %v1013_v0 }
 0x1ea   :  { %853 = vmatpush3.msra.mxu1 %v533_v32 }
 0x1eb   :  { %854 = vmatprep.subr.mxu1 %v1013_v0 }
 0x1ec   :  { %855 = vmatpush3.msra.mxu1 %v532_v33 }
 0x1ed   :  { %856 = vmatprep.subr.mxu1 %v1013_v0 }
 0x1ee   :  { %857 = vmatpush3.msra.mxu1 %v531_v34 }
 0x1ef   :  { %858 = vmatprep.subr.mxu1 %v1013_v0 }
 0x1f0   :  { %859 = vmatpush3.msra.mxu1 %v530_v35 }
 0x291   :  { %v427_v27 = vpop.f32.mrf.mxu1 }
 0x292   :  { %v428_v28 = vadd.f32 %v427_v27, %v241_v23 }
 0x293   :  { %v792_v29 = vpop.f32.mrf.mxu1 }
 0x294   :  { %v435_v30 = vadd.f32 %v434_v26, %v428_v28 }
 0x296   :  { %v436_v31 = vmax.f32 %v435_v30, 0.0 }
 0x298   :  { %826 = vmatmul.mubr.f32.vlgmr.msra.gmra.mxu0 %v436_v31 }
 0x358   :  { %v520_v38 = vpop.f32.mrf.mxu0 }
 0x359   :  { %v521_v40 = vadd.f32 %v520_v38, %v243_v25 }
 0x35a   :  { %v827_v42 = vpop.f32.mrf.mxu0 }
 0x35b   :  { %v528_v43 = vadd.f32 %v527_v37, %v521_v40 }
 0x35d   :  { %v529_v44 = vmax.f32 %v528_v43, 0.0 }
 0x35f   :  { %861 = vmatmul.mubr.f32.vlgmr.msra.gmra.mxu1 %v529_v44 }
 0x41f   :  { %v619_v46 = vpop.f32.mrf.mxu1 }
 0x420   :  { %v620_v0 = vadd.f32 %v654_v45, %v619_v46 }
 0x421   :  { %v862_v47 = vpop.f32.mrf.mxu1 }
 0x422   :  { %626 = vrot.lane.b32.xlu0 %v620_v0, %s1016_s29  ;;  %624 = vst.msk [vmem:[#allocation11] sm:$0xff] %vm623_vm2, %v620_v0 }
 0x423   :  { %987 = shalt.err (!%p984_p1)
}
 0x424   :  { %640 = dma.vmem_to_hbm [thread:$0]  %s638_s28, 128, %s1179_s6, [#allocation4]   ;;  %vm629_vm3 = vcmask 7168  }
 0x494   :  { %v627_v39 = vpop.permute.xlu0 %626 }
 0x495   :  { %630 = vst.msk [vmem:[%s1180_s7] sm:$0xff] %vm629_vm3, %v627_v39 }
 0x496   :  { %1002 = dma.done.wait [#allocation4], 128  }
 0x497   :  { %1003 = vsyncadd [#allocation4], 4294967168 }
 0x498   :  { %648 = vsyncpa [#allocation3], 1 }
 0x499   :  { %649 = vsyncpa [#allocation6], 1 }
 0x49a   :  { %650 = vsyncpa [#allocation9], 1 }
 0x49b   :  { %651 = vsyncpa [#allocation4], 1 }

</bundles_post_ra>
